<compile_context>
chip_gen: v5e
topology: v5e:2x2
jax: 0.10.0
libtpu: 0.0.40
codegen_flags: <defaults>
</compile_context>

<pallas_src>
import jax
import jax.numpy as jnp
import numpy as np
from jax.experimental import pallas as pl
from jax.experimental.pallas import tpu as pltpu

# small, BART-consistent sizes
B, T, S, E, H, F = 2, 8, 8, 32, 4, 64          # batch, tgt_len, src_len, d_model, heads, ffn
D = E // H                                      # head_dim
SCALE = float(D) ** -0.5
EPS = 1e-5                                      # nn.LayerNorm default eps


def _layernorm(x, g, b):
    mu = jnp.mean(x, axis=-1, keepdims=True)
    xc = x - mu
    var = jnp.mean(xc * xc, axis=-1, keepdims=True)
    return xc * jax.lax.rsqrt(var + EPS) * g + b


def _gelu(x):
    # exact (erf) GELU — matches torch.nn.functional.gelu used by ACT2FN["gelu"]
    return 0.5 * x * (1.0 + jax.lax.erf(x * (2.0 ** -0.5)))


# ----------------------------------------------------------------------------- kernel


def decoder_layer_kernel(
    hs_ref, enc_ref, mask_ref, enc_mask_ref,
    sa_qkv_w, sa_qkv_b, sa_o_w, sa_o_b, ln1g, ln1b,
    ca_q_w, ca_q_b, ca_kv_w, ca_kv_b, ca_o_w, ca_o_b, ln2g, ln2b,
    f1w, f1b, f2w, f2b, ln3g, ln3b,
    out_ref, sk_ref, sv_ref, ck_ref, cv_ref,
):
    # one grid step == one batch element
    hs = hs_ref[0]               # (T, E)
    enc = enc_ref[0]             # (S, E)
    mask = mask_ref[0]           # (T, T)   additive mask (broadcast over heads)
    enc_mask = enc_mask_ref[0]   # (T, S)

    def to_heads(x):             # (L, E) -> (H, L, D)
        L = x.shape[0]
        return jnp.transpose(x.reshape(L, H, D), (1, 0, 2))

    def mha(q2, k2, v2, ow, ob, m):
        # q2 (Tq, E) already scaled+biased; k2/v2 (Tk, E); m (Tq, Tk) additive mask.
        qh, kh, vh = to_heads(q2), to_heads(k2), to_heads(v2)        # (H, L, D)
        s = jnp.einsum('hqd,hkd->hqk', qh, kh,
                       preferred_element_type=jnp.float32) + m[None, :, :]
        s = s - jnp.max(s, axis=-1, keepdims=True)
        p = jnp.exp(s)
        p = p * pl.reciprocal(jnp.sum(p, axis=-1, keepdims=True), approx=True)
        o = jnp.einsum('hqk,hkd->hqd', p, vh,
                       preferred_element_type=jnp.float32)           # (H, Tq, D)
        ctx = jnp.transpose(o, (1, 0, 2)).reshape(q2.shape[0], E)    # (Tq, E)
        return jnp.dot(ctx, ow[...], preferred_element_type=jnp.float32) + ob[...]

    # --- self attention block (fused QKV projection: one (T,E)@(E,3E) matmul) ---
    qkv = jnp.dot(hs, sa_qkv_w[...], preferred_element_type=jnp.float32) + sa_qkv_b[...]
    q = qkv[:, 0:E] * SCALE          # scale after bias, matching the reference
    k = qkv[:, E:2 * E]
    v = qkv[:, 2 * E:3 * E]
    sk_ref[0] = k                    # present_key_value, lane-dense (T, E)
    sv_ref[0] = v
    x = _layernorm(hs + mha(q, k, v, sa_o_w, sa_o_b, mask), ln1g[...], ln1b[...])

    # --- cross attention block (Q from decoder state, fused KV from encoder states) ---
    q = (jnp.dot(x, ca_q_w[...], preferred_element_type=jnp.float32) + ca_q_b[...]) * SCALE
    kv = jnp.dot(enc, ca_kv_w[...], preferred_element_type=jnp.float32) + ca_kv_b[...]
    k = kv[:, 0:E]
    v = kv[:, E:2 * E]
    ck_ref[0] = k
    cv_ref[0] = v
    x = _layernorm(x + mha(q, k, v, ca_o_w, ca_o_b, enc_mask), ln2g[...], ln2b[...])

    # --- feed-forward block ---
    hdn = _gelu(jnp.dot(x, f1w[...], preferred_element_type=jnp.float32) + f1b[...])
    y = jnp.dot(hdn, f2w[...], preferred_element_type=jnp.float32) + f2b[...]
    x = _layernorm(x + y, ln3g[...], ln3b[...])

    out_ref[0] = x


# ----------------------------------------------------------------------------- wrapper glue


def bart_decoder_layer(hs, enc, attn_mask, enc_attn_mask, p):
    """attn_mask: (B,1,T,T), enc_attn_mask: (B,1,T,S) additive masks (like the PyTorch module)."""
    # torch nn.Linear weight is (out, in): y = x @ W.T + b.  Fuse along the output (lane) axis.
    sa_qkv_w = jnp.concatenate([p['sa_q_w'].T, p['sa_k_w'].T, p['sa_v_w'].T], axis=1)   # (E, 3E)
    sa_qkv_b = jnp.concatenate([p['sa_q_b'], p['sa_k_b'], p['sa_v_b']]).reshape(1, 3 * E)
    ca_kv_w = jnp.concatenate([p['ca_k_w'].T, p['ca_v_w'].T], axis=1)                   # (E, 2E)
    ca_kv_b = jnp.concatenate([p['ca_k_b'], p['ca_v_b']]).reshape(1, 2 * E)

    args = (
        hs, enc, attn_mask[:, 0], enc_attn_mask[:, 0],
        sa_qkv_w, sa_qkv_b, p['sa_o_w'].T, p['sa_o_b'].reshape(1, E),
        p['ln1_g'].reshape(1, E), p['ln1_b'].reshape(1, E),
        p['ca_q_w'].T, p['ca_q_b'].reshape(1, E), ca_kv_w, ca_kv_b,
        p['ca_o_w'].T, p['ca_o_b'].reshape(1, E),
        p['ln2_g'].reshape(1, E), p['ln2_b'].reshape(1, E),
        p['fc1_w'].T, p['fc1_b'].reshape(1, F),
        p['fc2_w'].T, p['fc2_b'].reshape(1, E),
        p['ln3_g'].reshape(1, E), p['ln3_b'].reshape(1, E),
    )

    def batched_spec(a):
        zeros = (0,) * (a.ndim - 1)
        return pl.BlockSpec((1,) + a.shape[1:], lambda b: (b,) + zeros)

    def full_spec(a):
        zeros = (0,) * a.ndim
        return pl.BlockSpec(a.shape, lambda b: zeros)

    in_specs = [batched_spec(a) for a in args[:4]] + [full_spec(a) for a in args[4:]]

    out_shape = (
        jax.ShapeDtypeStruct((B, T, E), jnp.float32),   # hidden_states out
        jax.ShapeDtypeStruct((B, T, E), jnp.float32),   # self K  (lane-dense, split later)
        jax.ShapeDtypeStruct((B, T, E), jnp.float32),   # self V
        jax.ShapeDtypeStruct((B, S, E), jnp.float32),   # cross K
        jax.ShapeDtypeStruct((B, S, E), jnp.float32),   # cross V
    )
    out_specs = tuple(
        pl.BlockSpec((1,) + s.shape[1:], lambda b: (b, 0, 0)) for s in out_shape
    )

    out, sk, sv, ck, cv = pl.pallas_call(
        decoder_layer_kernel,
        grid=(B,),
        out_shape=out_shape,
        in_specs=in_specs,
        out_specs=out_specs,
        compiler_params=pltpu.CompilerParams(dimension_semantics=("parallel",)),
    )(*args)

    # present_key_value in the PyTorch (B, H, L, D) layout — done in plain JAX glue
    split = lambda a: jnp.transpose(a.reshape(a.shape[0], a.shape[1], H, D), (0, 2, 1, 3))
    return out, (split(sk), split(sv), split(ck), split(cv))


# ----------------------------------------------------------------------------- pure-JAX reference


def _ref_attention(xq, xkv, Wq, bq, Wk, bk, Wv, bv, Wo, bo, mask):
    bsz, lq, _ = xq.shape
    lk = xkv.shape[1]
    q = (xq @ Wq.T + bq) * SCALE
    k = xkv @ Wk.T + bk
    v = xkv @ Wv.T + bv
    shp = lambda t, l: t.reshape(bsz, l, H, D).transpose(0, 2, 1, 3)
    q, k, v = shp(q, lq), shp(k, lk), shp(v, lk)
    s = jnp.einsum('bhqd,bhkd->bhqk', q, k) + mask
    p = jax.nn.softmax(s, axis=-1)
    o = jnp.einsum('bhqk,bhkd->bhqd', p, v)
    o = o.transpose(0, 2, 1, 3).reshape(bsz, lq, E)
    return o @ Wo.T + bo, k, v


def ref_decoder_layer(hs, enc, attn_mask, enc_attn_mask, p):
    a, sk, sv = _ref_attention(hs, hs, p['sa_q_w'], p['sa_q_b'], p['sa_k_w'], p['sa_k_b'],
                               p['sa_v_w'], p['sa_v_b'], p['sa_o_w'], p['sa_o_b'], attn_mask)
    x = _layernorm(hs + a, p['ln1_g'], p['ln1_b'])
    c, ck, cv = _ref_attention(x, enc, p['ca_q_w'], p['ca_q_b'], p['ca_k_w'], p['ca_k_b'],
                               p['ca_v_w'], p['ca_v_b'], p['ca_o_w'], p['ca_o_b'], enc_attn_mask)
    x = _layernorm(x + c, p['ln2_g'], p['ln2_b'])
    y = _gelu(x @ p['fc1_w'].T + p['fc1_b']) @ p['fc2_w'].T + p['fc2_b']
    x = _layernorm(x + y, p['ln3_g'], p['ln3_b'])
    return x, (sk, sv, ck, cv)


# ----------------------------------------------------------------------------- main


if __name__ == "__main__":
    key = jax.random.PRNGKey(0)
    ks = iter(jax.random.split(key, 64))
    nrm = lambda shape, s=0.05: jax.random.normal(next(ks), shape, jnp.float32) * s

    params = {}
    for pre in ('sa', 'ca'):
        for name in ('q', 'k', 'v', 'o'):
            params[f'{pre}_{name}_w'] = nrm((E, E))
            params[f'{pre}_{name}_b'] = nrm((E,))
    params['fc1_w'] = nrm((F, E)); params['fc1_b'] = nrm((F,))
    params['fc2_w'] = nrm((E, F)); params['fc2_b'] = nrm((E,))
    for i in (1, 2, 3):
        params[f'ln{i}_g'] = 1.0 + nrm((E,), 0.1)
        params[f'ln{i}_b'] = nrm((E,), 0.1)

    hidden_states = jax.random.normal(next(ks), (B, T, E), jnp.float32) * 0.5
    encoder_hidden_states = jax.random.normal(next(ks), (B, S, E), jnp.float32) * 0.5

    # causal decoder self-attention mask (B, 1, T, T)
    causal = jnp.where(jnp.arange(T)[:, None] >= jnp.arange(T)[None, :], 0.0, -1e9)
    attention_mask = jnp.broadcast_to(causal, (B, 1, T, T)).astype(jnp.float32)
    # encoder padding mask (B, 1, T, S): mask the last two source tokens of batch 1
    pad = jnp.zeros((B, S), jnp.float32).at[1, S - 2:].set(-1e9)
    encoder_attention_mask = jnp.broadcast_to(pad[:, None, None, :], (B, 1, T, S))

    out, present_kv = bart_decoder_layer(hidden_states, encoder_hidden_states,
                                         attention_mask, encoder_attention_mask, params)
    out = jax.block_until_ready(out)
    present_kv = jax.block_until_ready(present_kv)

    ref_out, ref_kv = ref_decoder_layer(hidden_states, encoder_hidden_states,
                                        attention_mask, encoder_attention_mask, params)

    # hidden states: slightly looser tolerance because the softmax uses the EUP
    # approx reciprocal (review-sanctioned); K/V are exact matmuls -> tight check.
    assert np.allclose(np.asarray(out), np.asarray(ref_out), rtol=1e-3, atol=1e-3), "hidden_states mismatch"
    for got, want in zip(present_kv, ref_kv):
        assert np.allclose(np.asarray(got), np.asarray(want), rtol=1e-4, atol=1e-4), "present_key_value mismatch"

    print("KERNEL_OK")
</pallas_src>

<mosaic_0001>
module attributes {stable_mosaic.version = 11 : i64} {
  func.func @decoder_layer_kernel(%arg0: i32, %arg1: memref<1x8x32xf32, #tpu.memory_space<vmem>>, %arg2: memref<1x8x32xf32, #tpu.memory_space<vmem>>, %arg3: memref<1x8x8xf32, #tpu.memory_space<vmem>>, %arg4: memref<1x8x8xf32, #tpu.memory_space<vmem>>, %arg5: memref<32x96xf32, #tpu.memory_space<vmem>>, %arg6: memref<1x96xf32, #tpu.memory_space<vmem>>, %arg7: memref<32x32xf32, #tpu.memory_space<vmem>>, %arg8: memref<1x32xf32, #tpu.memory_space<vmem>>, %arg9: memref<1x32xf32, #tpu.memory_space<vmem>>, %arg10: memref<1x32xf32, #tpu.memory_space<vmem>>, %arg11: memref<32x32xf32, #tpu.memory_space<vmem>>, %arg12: memref<1x32xf32, #tpu.memory_space<vmem>>, %arg13: memref<32x64xf32, #tpu.memory_space<vmem>>, %arg14: memref<1x64xf32, #tpu.memory_space<vmem>>, %arg15: memref<32x32xf32, #tpu.memory_space<vmem>>, %arg16: memref<1x32xf32, #tpu.memory_space<vmem>>, %arg17: memref<1x32xf32, #tpu.memory_space<vmem>>, %arg18: memref<1x32xf32, #tpu.memory_space<vmem>>, %arg19: memref<32x64xf32, #tpu.memory_space<vmem>>, %arg20: memref<1x64xf32, #tpu.memory_space<vmem>>, %arg21: memref<64x32xf32, #tpu.memory_space<vmem>>, %arg22: memref<1x32xf32, #tpu.memory_space<vmem>>, %arg23: memref<1x32xf32, #tpu.memory_space<vmem>>, %arg24: memref<1x32xf32, #tpu.memory_space<vmem>>, %arg25: memref<1x8x32xf32, #tpu.memory_space<vmem>>, %arg26: memref<1x8x32xf32, #tpu.memory_space<vmem>>, %arg27: memref<1x8x32xf32, #tpu.memory_space<vmem>>, %arg28: memref<1x8x32xf32, #tpu.memory_space<vmem>>, %arg29: memref<1x8x32xf32, #tpu.memory_space<vmem>>) attributes {dimension_semantics = [#tpu.dimension_semantics<parallel>], iteration_bounds = array<i64: 2>, scalar_prefetch = 0 : i64, scratch_operands = 0 : i64, tpu.core_type = #tpu.core_type<tc>, window_params = [{transform_indices = @transform_0, window_bounds = array<i64: 1, 8, 32>}, {transform_indices = @transform_1, window_bounds = array<i64: 1, 8, 32>}, {transform_indices = @transform_2, window_bounds = array<i64: 1, 8, 8>}, {transform_indices = @transform_3, window_bounds = array<i64: 1, 8, 8>}, {pipeline_mode = #tpu.pipeline_mode<synchronous>, transform_indices = @transform_4, window_bounds = array<i64: 32, 96>}, {pipeline_mode = #tpu.pipeline_mode<synchronous>, transform_indices = @transform_5, window_bounds = array<i64: 1, 96>}, {pipeline_mode = #tpu.pipeline_mode<synchronous>, transform_indices = @transform_6, window_bounds = array<i64: 32, 32>}, {pipeline_mode = #tpu.pipeline_mode<synchronous>, transform_indices = @transform_7, window_bounds = array<i64: 1, 32>}, {pipeline_mode = #tpu.pipeline_mode<synchronous>, transform_indices = @transform_8, window_bounds = array<i64: 1, 32>}, {pipeline_mode = #tpu.pipeline_mode<synchronous>, transform_indices = @transform_9, window_bounds = array<i64: 1, 32>}, {pipeline_mode = #tpu.pipeline_mode<synchronous>, transform_indices = @transform_10, window_bounds = array<i64: 32, 32>}, {pipeline_mode = #tpu.pipeline_mode<synchronous>, transform_indices = @transform_11, window_bounds = array<i64: 1, 32>}, {pipeline_mode = #tpu.pipeline_mode<synchronous>, transform_indices = @transform_12, window_bounds = array<i64: 32, 64>}, {pipeline_mode = #tpu.pipeline_mode<synchronous>, transform_indices = @transform_13, window_bounds = array<i64: 1, 64>}, {pipeline_mode = #tpu.pipeline_mode<synchronous>, transform_indices = @transform_14, window_bounds = array<i64: 32, 32>}, {pipeline_mode = #tpu.pipeline_mode<synchronous>, transform_indices = @transform_15, window_bounds = array<i64: 1, 32>}, {pipeline_mode = #tpu.pipeline_mode<synchronous>, transform_indices = @transform_16, window_bounds = array<i64: 1, 32>}, {pipeline_mode = #tpu.pipeline_mode<synchronous>, transform_indices = @transform_17, window_bounds = array<i64: 1, 32>}, {pipeline_mode = #tpu.pipeline_mode<synchronous>, transform_indices = @transform_18, window_bounds = array<i64: 32, 64>}, {pipeline_mode = #tpu.pipeline_mode<synchronous>, transform_indices = @transform_19, window_bounds = array<i64: 1, 64>}, {pipeline_mode = #tpu.pipeline_mode<synchronous>, transform_indices = @transform_20, window_bounds = array<i64: 64, 32>}, {pipeline_mode = #tpu.pipeline_mode<synchronous>, transform_indices = @transform_21, window_bounds = array<i64: 1, 32>}, {pipeline_mode = #tpu.pipeline_mode<synchronous>, transform_indices = @transform_22, window_bounds = array<i64: 1, 32>}, {pipeline_mode = #tpu.pipeline_mode<synchronous>, transform_indices = @transform_23, window_bounds = array<i64: 1, 32>}, {transform_indices = @transform_24, window_bounds = array<i64: 1, 8, 32>}, {transform_indices = @transform_25, window_bounds = array<i64: 1, 8, 32>}, {transform_indices = @transform_26, window_bounds = array<i64: 1, 8, 32>}, {transform_indices = @transform_27, window_bounds = array<i64: 1, 8, 32>}, {transform_indices = @transform_28, window_bounds = array<i64: 1, 8, 32>}]} {
    %c0 = arith.constant 0 : index
    %c0_0 = arith.constant 0 : index
    %c0_1 = arith.constant 0 : index
    %0 = vector.load %arg1[%c0, %c0_0, %c0_1] : memref<1x8x32xf32, #tpu.memory_space<vmem>>, vector<1x8x32xf32>
    %1 = vector.shape_cast %0 : vector<1x8x32xf32> to vector<8x32xf32>
    %c0_2 = arith.constant 0 : index
    %c0_3 = arith.constant 0 : index
    %c0_4 = arith.constant 0 : index
    %2 = vector.load %arg2[%c0_2, %c0_3, %c0_4] : memref<1x8x32xf32, #tpu.memory_space<vmem>>, vector<1x8x32xf32>
    %3 = vector.shape_cast %2 : vector<1x8x32xf32> to vector<8x32xf32>
    %c0_5 = arith.constant 0 : index
    %c0_6 = arith.constant 0 : index
    %c0_7 = arith.constant 0 : index
    %4 = vector.load %arg3[%c0_5, %c0_6, %c0_7] : memref<1x8x8xf32, #tpu.memory_space<vmem>>, vector<1x8x8xf32>
    %5 = vector.shape_cast %4 : vector<1x8x8xf32> to vector<8x8xf32>
    %c0_8 = arith.constant 0 : index
    %c0_9 = arith.constant 0 : index
    %c0_10 = arith.constant 0 : index
    %6 = vector.load %arg4[%c0_8, %c0_9, %c0_10] : memref<1x8x8xf32, #tpu.memory_space<vmem>>, vector<1x8x8xf32>
    %7 = vector.shape_cast %6 : vector<1x8x8xf32> to vector<8x8xf32>
    %c0_11 = arith.constant 0 : index
    %c0_12 = arith.constant 0 : index
    %8 = vector.load %arg5[%c0_11, %c0_12] : memref<32x96xf32, #tpu.memory_space<vmem>>, vector<32x96xf32>
    %cst = arith.constant dense<0.000000e+00> : vector<8x96xf32>
    %9 = tpu.matmul %1, %8, %cst {dimension_numbers = #tpu.dot_dimension_numbers<[1], [0], [0], [1], [0, 0, 1, 1], [], []>} : vector<8x32xf32>, vector<32x96xf32>, vector<8x96xf32> -> vector<8x96xf32>
    %c0_13 = arith.constant 0 : index
    %c0_14 = arith.constant 0 : index
    %10 = vector.load %arg6[%c0_13, %c0_14] : memref<1x96xf32, #tpu.memory_space<vmem>>, vector<1x96xf32>
    %11 = vector.broadcast %10 : vector<1x96xf32> to vector<8x96xf32>
    %12 = arith.addf %9, %11 : vector<8x96xf32>
    %13 = vector.extract_strided_slice %12 {offsets = [0, 0], sizes = [8, 32], strides = [1, 1]} : vector<8x96xf32> to vector<8x32xf32>
    %cst_15 = arith.constant 0.353553385 : f32
    %14 = vector.broadcast %cst_15 : f32 to vector<8x32xf32>
    %15 = arith.mulf %13, %14 : vector<8x32xf32>
    %16 = vector.extract_strided_slice %12 {offsets = [0, 32], sizes = [8, 32], strides = [1, 1]} : vector<8x96xf32> to vector<8x32xf32>
    %17 = vector.extract_strided_slice %12 {offsets = [0, 64], sizes = [8, 32], strides = [1, 1]} : vector<8x96xf32> to vector<8x32xf32>
    %c0_16 = arith.constant 0 : index
    %c0_17 = arith.constant 0 : index
    %c0_18 = arith.constant 0 : index
    %18 = vector.load %arg26[%c0_16, %c0_17, %c0_18] : memref<1x8x32xf32, #tpu.memory_space<vmem>>, vector<1x8x32xf32>
    %19 = vector.shape_cast %18 : vector<1x8x32xf32> to vector<8x32xf32>
    %20 = vector.shape_cast %16 : vector<8x32xf32> to vector<1x8x32xf32>
    tpu.vector_store %arg26[%c0_16, %c0_17, %c0_18], %20 {strides = array<i32>} : memref<1x8x32xf32, #tpu.memory_space<vmem>>, vector<1x8x32xf32>,
    %c0_19 = arith.constant 0 : index
    %c0_20 = arith.constant 0 : index
    %c0_21 = arith.constant 0 : index
    %21 = vector.load %arg27[%c0_19, %c0_20, %c0_21] : memref<1x8x32xf32, #tpu.memory_space<vmem>>, vector<1x8x32xf32>
    %22 = vector.shape_cast %21 : vector<1x8x32xf32> to vector<8x32xf32>
    %23 = vector.shape_cast %17 : vector<8x32xf32> to vector<1x8x32xf32>
    tpu.vector_store %arg27[%c0_19, %c0_20, %c0_21], %23 {strides = array<i32>} : memref<1x8x32xf32, #tpu.memory_space<vmem>>, vector<1x8x32xf32>,
    %24 = vector.shape_cast %15 : vector<8x32xf32> to vector<8x4x8xf32>
    %25 = tpu.transpose %24, [1, 0, 2] : vector<8x4x8xf32> -> vector<4x8x8xf32>
    %26 = vector.shape_cast %16 : vector<8x32xf32> to vector<8x4x8xf32>
    %27 = tpu.transpose %26, [1, 0, 2] : vector<8x4x8xf32> -> vector<4x8x8xf32>
    %28 = vector.shape_cast %17 : vector<8x32xf32> to vector<8x4x8xf32>
    %29 = tpu.transpose %28, [1, 0, 2] : vector<8x4x8xf32> -> vector<4x8x8xf32>
    "tpu.trace_start"() <{level = 10 : i32, message = "hqd,hkd->hqk"}> : () -> ()
    %cst_22 = arith.constant dense<0.000000e+00> : vector<4x8x8xf32>
    %30 = tpu.matmul %25, %27, %cst_22 {dimension_numbers = #tpu.dot_dimension_numbers<[2], [2], [1], [1], [0, 0, 0, 1, 1, 1], [0], [0]>} : vector<4x8x8xf32>, vector<4x8x8xf32>, vector<4x8x8xf32> -> vector<4x8x8xf32>
    "tpu.trace_stop"() : () -> ()
    %31 = vector.shape_cast %5 : vector<8x8xf32> to vector<1x8x8xf32>
    %32 = vector.broadcast %31 : vector<1x8x8xf32> to vector<4x8x8xf32>
    %33 = arith.addf %30, %32 : vector<4x8x8xf32>
    %cst_23 = arith.constant dense<0xFF800000> : vector<4x8xf32>
    %34 = vector.multi_reduction <maximumf>, %33, %cst_23 [2] : vector<4x8x8xf32> to vector<4x8xf32>
    %35 = vector.shape_cast %34 : vector<4x8xf32> to vector<4x8x1xf32>
    %36 = vector.broadcast %35 : vector<4x8x1xf32> to vector<4x8x8xf32>
    %37 = arith.subf %33, %36 : vector<4x8x8xf32>
    %38 = math.exp %37 : vector<4x8x8xf32>
    %cst_24 = arith.constant dense<0.000000e+00> : vector<4x8xf32>
    %39 = vector.multi_reduction <add>, %38, %cst_24 [2] : vector<4x8x8xf32> to vector<4x8xf32>
    %40 = vector.shape_cast %39 : vector<4x8xf32> to vector<4x8x1xf32>
    %41 = tpu.reciprocal %40 {approx = true} : vector<4x8x1xf32> -> vector<4x8x1xf32>
    %42 = vector.broadcast %41 : vector<4x8x1xf32> to vector<4x8x8xf32>
    %43 = arith.mulf %38, %42 : vector<4x8x8xf32>
    "tpu.trace_start"() <{level = 10 : i32, message = "hqk,hkd->hqd"}> : () -> ()
    %cst_25 = arith.constant dense<0.000000e+00> : vector<4x8x8xf32>
    %44 = tpu.matmul %43, %29, %cst_25 {dimension_numbers = #tpu.dot_dimension_numbers<[2], [1], [1], [2], [0, 0, 0, 1, 1, 2], [0], [0]>} : vector<4x8x8xf32>, vector<4x8x8xf32>, vector<4x8x8xf32> -> vector<4x8x8xf32>
    "tpu.trace_stop"() : () -> ()
    %45 = tpu.transpose %44, [1, 0, 2] : vector<4x8x8xf32> -> vector<8x4x8xf32>
    %46 = vector.shape_cast %45 : vector<8x4x8xf32> to vector<8x32xf32>
    %c0_26 = arith.constant 0 : index
    %c0_27 = arith.constant 0 : index
    %47 = vector.load %arg7[%c0_26, %c0_27] : memref<32x32xf32, #tpu.memory_space<vmem>>, vector<32x32xf32>
    %cst_28 = arith.constant dense<0.000000e+00> : vector<8x32xf32>
    %48 = tpu.matmul %46, %47, %cst_28 {dimension_numbers = #tpu.dot_dimension_numbers<[1], [0], [0], [1], [0, 0, 1, 1], [], []>} : vector<8x32xf32>, vector<32x32xf32>, vector<8x32xf32> -> vector<8x32xf32>
    %c0_29 = arith.constant 0 : index
    %c0_30 = arith.constant 0 : index
    %49 = vector.load %arg8[%c0_29, %c0_30] : memref<1x32xf32, #tpu.memory_space<vmem>>, vector<1x32xf32>
    %50 = vector.broadcast %49 : vector<1x32xf32> to vector<8x32xf32>
    %51 = arith.addf %48, %50 : vector<8x32xf32>
    %52 = arith.addf %1, %51 : vector<8x32xf32>
    %c0_31 = arith.constant 0 : index
    %c0_32 = arith.constant 0 : index
    %53 = vector.load %arg9[%c0_31, %c0_32] : memref<1x32xf32, #tpu.memory_space<vmem>>, vector<1x32xf32>
    %c0_33 = arith.constant 0 : index
    %c0_34 = arith.constant 0 : index
    %54 = vector.load %arg10[%c0_33, %c0_34] : memref<1x32xf32, #tpu.memory_space<vmem>>, vector<1x32xf32>
    %cst_35 = arith.constant dense<0.000000e+00> : vector<8xf32>
    %55 = vector.multi_reduction <add>, %52, %cst_35 [1] : vector<8x32xf32> to vector<8xf32>
    %56 = vector.shape_cast %55 : vector<8xf32> to vector<8x1xf32>
    %cst_36 = arith.constant 3.200000e+01 : f32
    %57 = vector.broadcast %cst_36 : f32 to vector<8x1xf32>
    %58 = arith.divf %56, %57 : vector<8x1xf32>
    %59 = vector.broadcast %58 : vector<8x1xf32> to vector<8x32xf32>
    %60 = arith.subf %52, %59 : vector<8x32xf32>
    %61 = arith.mulf %60, %60 : vector<8x32xf32>
    %cst_37 = arith.constant dense<0.000000e+00> : vector<8xf32>
    %62 = vector.multi_reduction <add>, %61, %cst_37 [1] : vector<8x32xf32> to vector<8xf32>
    %63 = vector.shape_cast %62 : vector<8xf32> to vector<8x1xf32>
    %cst_38 = arith.constant 3.200000e+01 : f32
    %64 = vector.broadcast %cst_38 : f32 to vector<8x1xf32>
    %65 = arith.divf %63, %64 : vector<8x1xf32>
    %cst_39 = arith.constant 9.99999974E-6 : f32
    %66 = vector.broadcast %cst_39 : f32 to vector<8x1xf32>
    %67 = arith.addf %65, %66 : vector<8x1xf32>
    %68 = math.rsqrt %67 : vector<8x1xf32>
    %69 = vector.broadcast %68 : vector<8x1xf32> to vector<8x32xf32>
    %70 = arith.mulf %60, %69 : vector<8x32xf32>
    %71 = vector.broadcast %53 : vector<1x32xf32> to vector<8x32xf32>
    %72 = arith.mulf %70, %71 : vector<8x32xf32>
    %73 = vector.broadcast %54 : vector<1x32xf32> to vector<8x32xf32>
    %74 = arith.addf %72, %73 : vector<8x32xf32>
    %c0_40 = arith.constant 0 : index
    %c0_41 = arith.constant 0 : index
    %75 = vector.load %arg11[%c0_40, %c0_41] : memref<32x32xf32, #tpu.memory_space<vmem>>, vector<32x32xf32>
    %cst_42 = arith.constant dense<0.000000e+00> : vector<8x32xf32>
    %76 = tpu.matmul %74, %75, %cst_42 {dimension_numbers = #tpu.dot_dimension_numbers<[1], [0], [0], [1], [0, 0, 1, 1], [], []>} : vector<8x32xf32>, vector<32x32xf32>, vector<8x32xf32> -> vector<8x32xf32>
    %c0_43 = arith.constant 0 : index
    %c0_44 = arith.constant 0 : index
    %77 = vector.load %arg12[%c0_43, %c0_44] : memref<1x32xf32, #tpu.memory_space<vmem>>, vector<1x32xf32>
    %78 = vector.broadcast %77 : vector<1x32xf32> to vector<8x32xf32>
    %79 = arith.addf %76, %78 : vector<8x32xf32>
    %cst_45 = arith.constant 0.353553385 : f32
    %80 = vector.broadcast %cst_45 : f32 to vector<8x32xf32>
    %81 = arith.mulf %79, %80 : vector<8x32xf32>
    %c0_46 = arith.constant 0 : index
    %c0_47 = arith.constant 0 : index
    %82 = vector.load %arg13[%c0_46, %c0_47] : memref<32x64xf32, #tpu.memory_space<vmem>>, vector<32x64xf32>
    %cst_48 = arith.constant dense<0.000000e+00> : vector<8x64xf32>
    %83 = tpu.matmul %3, %82, %cst_48 {dimension_numbers = #tpu.dot_dimension_numbers<[1], [0], [0], [1], [0, 0, 1, 1], [], []>} : vector<8x32xf32>, vector<32x64xf32>, vector<8x64xf32> -> vector<8x64xf32>
    %c0_49 = arith.constant 0 : index
    %c0_50 = arith.constant 0 : index
    %84 = vector.load %arg14[%c0_49, %c0_50] : memref<1x64xf32, #tpu.memory_space<vmem>>, vector<1x64xf32>
    %85 = vector.broadcast %84 : vector<1x64xf32> to vector<8x64xf32>
    %86 = arith.addf %83, %85 : vector<8x64xf32>
    %87 = vector.extract_strided_slice %86 {offsets = [0, 0], sizes = [8, 32], strides = [1, 1]} : vector<8x64xf32> to vector<8x32xf32>
    %88 = vector.extract_strided_slice %86 {offsets = [0, 32], sizes = [8, 32], strides = [1, 1]} : vector<8x64xf32> to vector<8x32xf32>
    %c0_51 = arith.constant 0 : index
    %c0_52 = arith.constant 0 : index
    %c0_53 = arith.constant 0 : index
    %89 = vector.load %arg28[%c0_51, %c0_52, %c0_53] : memref<1x8x32xf32, #tpu.memory_space<vmem>>, vector<1x8x32xf32>
    %90 = vector.shape_cast %89 : vector<1x8x32xf32> to vector<8x32xf32>
    %91 = vector.shape_cast %87 : vector<8x32xf32> to vector<1x8x32xf32>
    tpu.vector_store %arg28[%c0_51, %c0_52, %c0_53], %91 {strides = array<i32>} : memref<1x8x32xf32, #tpu.memory_space<vmem>>, vector<1x8x32xf32>,
    %c0_54 = arith.constant 0 : index
    %c0_55 = arith.constant 0 : index
    %c0_56 = arith.constant 0 : index
    %92 = vector.load %arg29[%c0_54, %c0_55, %c0_56] : memref<1x8x32xf32, #tpu.memory_space<vmem>>, vector<1x8x32xf32>
    %93 = vector.shape_cast %92 : vector<1x8x32xf32> to vector<8x32xf32>
    %94 = vector.shape_cast %88 : vector<8x32xf32> to vector<1x8x32xf32>
    tpu.vector_store %arg29[%c0_54, %c0_55, %c0_56], %94 {strides = array<i32>} : memref<1x8x32xf32, #tpu.memory_space<vmem>>, vector<1x8x32xf32>,
    %95 = vector.shape_cast %81 : vector<8x32xf32> to vector<8x4x8xf32>
    %96 = tpu.transpose %95, [1, 0, 2] : vector<8x4x8xf32> -> vector<4x8x8xf32>
    %97 = vector.shape_cast %87 : vector<8x32xf32> to vector<8x4x8xf32>
    %98 = tpu.transpose %97, [1, 0, 2] : vector<8x4x8xf32> -> vector<4x8x8xf32>
    %99 = vector.shape_cast %88 : vector<8x32xf32> to vector<8x4x8xf32>
    %100 = tpu.transpose %99, [1, 0, 2] : vector<8x4x8xf32> -> vector<4x8x8xf32>
    "tpu.trace_start"() <{level = 10 : i32, message = "hqd,hkd->hqk"}> : () -> ()
    %cst_57 = arith.constant dense<0.000000e+00> : vector<4x8x8xf32>
    %101 = tpu.matmul %96, %98, %cst_57 {dimension_numbers = #tpu.dot_dimension_numbers<[2], [2], [1], [1], [0, 0, 0, 1, 1, 1], [0], [0]>} : vector<4x8x8xf32>, vector<4x8x8xf32>, vector<4x8x8xf32> -> vector<4x8x8xf32>
    "tpu.trace_stop"() : () -> ()
    %102 = vector.shape_cast %7 : vector<8x8xf32> to vector<1x8x8xf32>
    %103 = vector.broadcast %102 : vector<1x8x8xf32> to vector<4x8x8xf32>
    %104 = arith.addf %101, %103 : vector<4x8x8xf32>
    %cst_58 = arith.constant dense<0xFF800000> : vector<4x8xf32>
    %105 = vector.multi_reduction <maximumf>, %104, %cst_58 [2] : vector<4x8x8xf32> to vector<4x8xf32>
    %106 = vector.shape_cast %105 : vector<4x8xf32> to vector<4x8x1xf32>
    %107 = vector.broadcast %106 : vector<4x8x1xf32> to vector<4x8x8xf32>
    %108 = arith.subf %104, %107 : vector<4x8x8xf32>
    %109 = math.exp %108 : vector<4x8x8xf32>
    %cst_59 = arith.constant dense<0.000000e+00> : vector<4x8xf32>
    %110 = vector.multi_reduction <add>, %109, %cst_59 [2] : vector<4x8x8xf32> to vector<4x8xf32>
    %111 = vector.shape_cast %110 : vector<4x8xf32> to vector<4x8x1xf32>
    %112 = tpu.reciprocal %111 {approx = true} : vector<4x8x1xf32> -> vector<4x8x1xf32>
    %113 = vector.broadcast %112 : vector<4x8x1xf32> to vector<4x8x8xf32>
    %114 = arith.mulf %109, %113 : vector<4x8x8xf32>
    "tpu.trace_start"() <{level = 10 : i32, message = "hqk,hkd->hqd"}> : () -> ()
    %cst_60 = arith.constant dense<0.000000e+00> : vector<4x8x8xf32>
    %115 = tpu.matmul %114, %100, %cst_60 {dimension_numbers = #tpu.dot_dimension_numbers<[2], [1], [1], [2], [0, 0, 0, 1, 1, 2], [0], [0]>} : vector<4x8x8xf32>, vector<4x8x8xf32>, vector<4x8x8xf32> -> vector<4x8x8xf32>
    "tpu.trace_stop"() : () -> ()
    %116 = tpu.transpose %115, [1, 0, 2] : vector<4x8x8xf32> -> vector<8x4x8xf32>
    %117 = vector.shape_cast %116 : vector<8x4x8xf32> to vector<8x32xf32>
    %c0_61 = arith.constant 0 : index
    %c0_62 = arith.constant 0 : index
    %118 = vector.load %arg15[%c0_61, %c0_62] : memref<32x32xf32, #tpu.memory_space<vmem>>, vector<32x32xf32>
    %cst_63 = arith.constant dense<0.000000e+00> : vector<8x32xf32>
    %119 = tpu.matmul %117, %118, %cst_63 {dimension_numbers = #tpu.dot_dimension_numbers<[1], [0], [0], [1], [0, 0, 1, 1], [], []>} : vector<8x32xf32>, vector<32x32xf32>, vector<8x32xf32> -> vector<8x32xf32>
    %c0_64 = arith.constant 0 : index
    %c0_65 = arith.constant 0 : index
    %120 = vector.load %arg16[%c0_64, %c0_65] : memref<1x32xf32, #tpu.memory_space<vmem>>, vector<1x32xf32>
    %121 = vector.broadcast %120 : vector<1x32xf32> to vector<8x32xf32>
    %122 = arith.addf %119, %121 : vector<8x32xf32>
    %123 = arith.addf %74, %122 : vector<8x32xf32>
    %c0_66 = arith.constant 0 : index
    %c0_67 = arith.constant 0 : index
    %124 = vector.load %arg17[%c0_66, %c0_67] : memref<1x32xf32, #tpu.memory_space<vmem>>, vector<1x32xf32>
    %c0_68 = arith.constant 0 : index
    %c0_69 = arith.constant 0 : index
    %125 = vector.load %arg18[%c0_68, %c0_69] : memref<1x32xf32, #tpu.memory_space<vmem>>, vector<1x32xf32>
    %cst_70 = arith.constant dense<0.000000e+00> : vector<8xf32>
    %126 = vector.multi_reduction <add>, %123, %cst_70 [1] : vector<8x32xf32> to vector<8xf32>
    %127 = vector.shape_cast %126 : vector<8xf32> to vector<8x1xf32>
    %cst_71 = arith.constant 3.200000e+01 : f32
    %128 = vector.broadcast %cst_71 : f32 to vector<8x1xf32>
    %129 = arith.divf %127, %128 : vector<8x1xf32>
    %130 = vector.broadcast %129 : vector<8x1xf32> to vector<8x32xf32>
    %131 = arith.subf %123, %130 : vector<8x32xf32>
    %132 = arith.mulf %131, %131 : vector<8x32xf32>
    %cst_72 = arith.constant dense<0.000000e+00> : vector<8xf32>
    %133 = vector.multi_reduction <add>, %132, %cst_72 [1] : vector<8x32xf32> to vector<8xf32>
    %134 = vector.shape_cast %133 : vector<8xf32> to vector<8x1xf32>
    %cst_73 = arith.constant 3.200000e+01 : f32
    %135 = vector.broadcast %cst_73 : f32 to vector<8x1xf32>
    %136 = arith.divf %134, %135 : vector<8x1xf32>
    %cst_74 = arith.constant 9.99999974E-6 : f32
    %137 = vector.broadcast %cst_74 : f32 to vector<8x1xf32>
    %138 = arith.addf %136, %137 : vector<8x1xf32>
    %139 = math.rsqrt %138 : vector<8x1xf32>
    %140 = vector.broadcast %139 : vector<8x1xf32> to vector<8x32xf32>
    %141 = arith.mulf %131, %140 : vector<8x32xf32>
    %142 = vector.broadcast %124 : vector<1x32xf32> to vector<8x32xf32>
    %143 = arith.mulf %141, %142 : vector<8x32xf32>
    %144 = vector.broadcast %125 : vector<1x32xf32> to vector<8x32xf32>
    %145 = arith.addf %143, %144 : vector<8x32xf32>
    %c0_75 = arith.constant 0 : index
    %c0_76 = arith.constant 0 : index
    %146 = vector.load %arg19[%c0_75, %c0_76] : memref<32x64xf32, #tpu.memory_space<vmem>>, vector<32x64xf32>
    %cst_77 = arith.constant dense<0.000000e+00> : vector<8x64xf32>
    %147 = tpu.matmul %145, %146, %cst_77 {dimension_numbers = #tpu.dot_dimension_numbers<[1], [0], [0], [1], [0, 0, 1, 1], [], []>} : vector<8x32xf32>, vector<32x64xf32>, vector<8x64xf32> -> vector<8x64xf32>
    %c0_78 = arith.constant 0 : index
    %c0_79 = arith.constant 0 : index
    %148 = vector.load %arg20[%c0_78, %c0_79] : memref<1x64xf32, #tpu.memory_space<vmem>>, vector<1x64xf32>
    %149 = vector.broadcast %148 : vector<1x64xf32> to vector<8x64xf32>
    %150 = arith.addf %147, %149 : vector<8x64xf32>
    %cst_80 = arith.constant 5.000000e-01 : f32
    %151 = vector.broadcast %cst_80 : f32 to vector<8x64xf32>
    %152 = arith.mulf %151, %150 : vector<8x64xf32>
    %cst_81 = arith.constant 0.707106769 : f32
    %153 = vector.broadcast %cst_81 : f32 to vector<8x64xf32>
    %154 = arith.mulf %150, %153 : vector<8x64xf32>
    %155 = math.erf %154 : vector<8x64xf32>
    %cst_82 = arith.constant 1.000000e+00 : f32
    %156 = vector.broadcast %cst_82 : f32 to vector<8x64xf32>
    %157 = arith.addf %156, %155 : vector<8x64xf32>
    %158 = arith.mulf %152, %157 : vector<8x64xf32>
    %c0_83 = arith.constant 0 : index
    %c0_84 = arith.constant 0 : index
    %159 = vector.load %arg21[%c0_83, %c0_84] : memref<64x32xf32, #tpu.memory_space<vmem>>, vector<64x32xf32>
    %cst_85 = arith.constant dense<0.000000e+00> : vector<8x32xf32>
    %160 = tpu.matmul %158, %159, %cst_85 {dimension_numbers = #tpu.dot_dimension_numbers<[1], [0], [0], [1], [0, 0, 1, 1], [], []>} : vector<8x64xf32>, vector<64x32xf32>, vector<8x32xf32> -> vector<8x32xf32>
    %c0_86 = arith.constant 0 : index
    %c0_87 = arith.constant 0 : index
    %161 = vector.load %arg22[%c0_86, %c0_87] : memref<1x32xf32, #tpu.memory_space<vmem>>, vector<1x32xf32>
    %162 = vector.broadcast %161 : vector<1x32xf32> to vector<8x32xf32>
    %163 = arith.addf %160, %162 : vector<8x32xf32>
    %164 = arith.addf %145, %163 : vector<8x32xf32>
    %c0_88 = arith.constant 0 : index
    %c0_89 = arith.constant 0 : index
    %165 = vector.load %arg23[%c0_88, %c0_89] : memref<1x32xf32, #tpu.memory_space<vmem>>, vector<1x32xf32>
    %c0_90 = arith.constant 0 : index
    %c0_91 = arith.constant 0 : index
    %166 = vector.load %arg24[%c0_90, %c0_91] : memref<1x32xf32, #tpu.memory_space<vmem>>, vector<1x32xf32>
    %cst_92 = arith.constant dense<0.000000e+00> : vector<8xf32>
    %167 = vector.multi_reduction <add>, %164, %cst_92 [1] : vector<8x32xf32> to vector<8xf32>
    %168 = vector.shape_cast %167 : vector<8xf32> to vector<8x1xf32>
    %cst_93 = arith.constant 3.200000e+01 : f32
    %169 = vector.broadcast %cst_93 : f32 to vector<8x1xf32>
    %170 = arith.divf %168, %169 : vector<8x1xf32>
    %171 = vector.broadcast %170 : vector<8x1xf32> to vector<8x32xf32>
    %172 = arith.subf %164, %171 : vector<8x32xf32>
    %173 = arith.mulf %172, %172 : vector<8x32xf32>
    %cst_94 = arith.constant dense<0.000000e+00> : vector<8xf32>
    %174 = vector.multi_reduction <add>, %173, %cst_94 [1] : vector<8x32xf32> to vector<8xf32>
    %175 = vector.shape_cast %174 : vector<8xf32> to vector<8x1xf32>
    %cst_95 = arith.constant 3.200000e+01 : f32
    %176 = vector.broadcast %cst_95 : f32 to vector<8x1xf32>
    %177 = arith.divf %175, %176 : vector<8x1xf32>
    %cst_96 = arith.constant 9.99999974E-6 : f32
    %178 = vector.broadcast %cst_96 : f32 to vector<8x1xf32>
    %179 = arith.addf %177, %178 : vector<8x1xf32>
    %180 = math.rsqrt %179 : vector<8x1xf32>
    %181 = vector.broadcast %180 : vector<8x1xf32> to vector<8x32xf32>
    %182 = arith.mulf %172, %181 : vector<8x32xf32>
    %183 = vector.broadcast %165 : vector<1x32xf32> to vector<8x32xf32>
    %184 = arith.mulf %182, %183 : vector<8x32xf32>
    %185 = vector.broadcast %166 : vector<1x32xf32> to vector<8x32xf32>
    %186 = arith.addf %184, %185 : vector<8x32xf32>
    %c0_97 = arith.constant 0 : index
    %c0_98 = arith.constant 0 : index
    %c0_99 = arith.constant 0 : index
    %187 = vector.load %arg25[%c0_97, %c0_98, %c0_99] : memref<1x8x32xf32, #tpu.memory_space<vmem>>, vector<1x8x32xf32>
    %188 = vector.shape_cast %187 : vector<1x8x32xf32> to vector<8x32xf32>
    %189 = vector.shape_cast %186 : vector<8x32xf32> to vector<1x8x32xf32>
    tpu.vector_store %arg25[%c0_97, %c0_98, %c0_99], %189 {strides = array<i32>} : memref<1x8x32xf32, #tpu.memory_space<vmem>>, vector<1x8x32xf32>,
    return
  }
  func.func @transform_0(%arg0: i32) -> (i32, i32, i32) {
    %c0_i32 = arith.constant 0 : i32
    %c0_i32_0 = arith.constant 0 : i32
    %c0_i32_1 = arith.constant 0 : i32
    return %arg0, %c0_i32, %c0_i32_0 : i32, i32, i32
  }
  func.func @transform_1(%arg0: i32) -> (i32, i32, i32) {
    %c0_i32 = arith.constant 0 : i32
    %c0_i32_0 = arith.constant 0 : i32
    %c0_i32_1 = arith.constant 0 : i32
    return %arg0, %c0_i32, %c0_i32_0 : i32, i32, i32
  }
  func.func @transform_2(%arg0: i32) -> (i32, i32, i32) {
    %c0_i32 = arith.constant 0 : i32
    %c0_i32_0 = arith.constant 0 : i32
    %c0_i32_1 = arith.constant 0 : i32
    return %arg0, %c0_i32, %c0_i32_0 : i32, i32, i32
  }
  func.func @transform_3(%arg0: i32) -> (i32, i32, i32) {
    %c0_i32 = arith.constant 0 : i32
    %c0_i32_0 = arith.constant 0 : i32
    %c0_i32_1 = arith.constant 0 : i32
    return %arg0, %c0_i32, %c0_i32_0 : i32, i32, i32
  }
  func.func @transform_4(%arg0: i32) -> (i32, i32) {
    %c0_i32 = arith.constant 0 : i32
    %c0_i32_0 = arith.constant 0 : i32
    %c0_i32_1 = arith.constant 0 : i32
    return %c0_i32, %c0_i32_0 : i32, i32
  }
  func.func @transform_5(%arg0: i32) -> (i32, i32) {
    %c0_i32 = arith.constant 0 : i32
    %c0_i32_0 = arith.constant 0 : i32
    %c0_i32_1 = arith.constant 0 : i32
    return %c0_i32, %c0_i32_0 : i32, i32
  }
  func.func @transform_6(%arg0: i32) -> (i32, i32) {
    %c0_i32 = arith.constant 0 : i32
    %c0_i32_0 = arith.constant 0 : i32
    %c0_i32_1 = arith.constant 0 : i32
    return %c0_i32, %c0_i32_0 : i32, i32
  }
  func.func @transform_7(%arg0: i32) -> (i32, i32) {
    %c0_i32 = arith.constant 0 : i32
    %c0_i32_0 = arith.constant 0 : i32
    %c0_i32_1 = arith.constant 0 : i32
    return %c0_i32, %c0_i32_0 : i32, i32
  }
  func.func @transform_8(%arg0: i32) -> (i32, i32) {
    %c0_i32 = arith.constant 0 : i32
    %c0_i32_0 = arith.constant 0 : i32
    %c0_i32_1 = arith.constant 0 : i32
    return %c0_i32, %c0_i32_0 : i32, i32
  }
  func.func @transform_9(%arg0: i32) -> (i32, i32) {
    %c0_i32 = arith.constant 0 : i32
    %c0_i32_0 = arith.constant 0 : i32
    %c0_i32_1 = arith.constant 0 : i32
    return %c0_i32, %c0_i32_0 : i32, i32
  }
  func.func @transform_10(%arg0: i32) -> (i32, i32) {
    %c0_i32 = arith.constant 0 : i32
    %c0_i32_0 = arith.constant 0 : i32
    %c0_i32_1 = arith.constant 0 : i32
    return %c0_i32, %c0_i32_0 : i32, i32
  }
  func.func @transform_11(%arg0: i32) -> (i32, i32) {
    %c0_i32 = arith.constant 0 : i32
    %c0_i32_0 = arith.constant 0 : i32
    %c0_i32_1 = arith.constant 0 : i32
    return %c0_i32, %c0_i32_0 : i32, i32
  }
  func.func @transform_12(%arg0: i32) -> (i32, i32) {
    %c0_i32 = arith.constant 0 : i32
    %c0_i32_0 = arith.constant 0 : i32
    %c0_i32_1 = arith.constant 0 : i32
    return %c0_i32, %c0_i32_0 : i32, i32
  }
  func.func @transform_13(%arg0: i32) -> (i32, i32) {
    %c0_i32 = arith.constant 0 : i32
    %c0_i32_0 = arith.constant 0 : i32
    %c0_i32_1 = arith.constant 0 : i32
    return %c0_i32, %c0_i32_0 : i32, i32
  }
  func.func @transform_14(%arg0: i32) -> (i32, i32) {
    %c0_i32 = arith.constant 0 : i32
    %c0_i32_0 = arith.constant 0 : i32
    %c0_i32_1 = arith.constant 0 : i32
    return %c0_i32, %c0_i32_0 : i32, i32
  }
  func.func @transform_15(%arg0: i32) -> (i32, i32) {
    %c0_i32 = arith.constant 0 : i32
    %c0_i32_0 = arith.constant 0 : i32
    %c0_i32_1 = arith.constant 0 : i32
    return %c0_i32, %c0_i32_0 : i32, i32
  }
  func.func @transform_16(%arg0: i32) -> (i32, i32) {
    %c0_i32 = arith.constant 0 : i32
    %c0_i32_0 = arith.constant 0 : i32
    %c0_i32_1 = arith.constant 0 : i32
    return %c0_i32, %c0_i32_0 : i32, i32
  }
  func.func @transform_17(%arg0: i32) -> (i32, i32) {
    %c0_i32 = arith.constant 0 : i32
    %c0_i32_0 = arith.constant 0 : i32
    %c0_i32_1 = arith.constant 0 : i32
    return %c0_i32, %c0_i32_0 : i32, i32
  }
  func.func @transform_18(%arg0: i32) -> (i32, i32) {
    %c0_i32 = arith.constant 0 : i32
    %c0_i32_0 = arith.constant 0 : i32
    %c0_i32_1 = arith.constant 0 : i32
    return %c0_i32, %c0_i32_0 : i32, i32
  }
  func.func @transform_19(%arg0: i32) -> (i32, i32) {
    %c0_i32 = arith.constant 0 : i32
    %c0_i32_0 = arith.constant 0 : i32
    %c0_i32_1 = arith.constant 0 : i32
    return %c0_i32, %c0_i32_0 : i32, i32
  }
  func.func @transform_20(%arg0: i32) -> (i32, i32) {
    %c0_i32 = arith.constant 0 : i32
    %c0_i32_0 = arith.constant 0 : i32
    %c0_i32_1 = arith.constant 0 : i32
    return %c0_i32, %c0_i32_0 : i32, i32
  }
  func.func @transform_21(%arg0: i32) -> (i32, i32) {
    %c0_i32 = arith.constant 0 : i32
    %c0_i32_0 = arith.constant 0 : i32
    %c0_i32_1 = arith.constant 0 : i32
    return %c0_i32, %c0_i32_0 : i32, i32
  }
  func.func @transform_22(%arg0: i32) -> (i32, i32) {
    %c0_i32 = arith.constant 0 : i32
    %c0_i32_0 = arith.constant 0 : i32
    %c0_i32_1 = arith.constant 0 : i32
    return %c0_i32, %c0_i32_0 : i32, i32
  }
  func.func @transform_23(%arg0: i32) -> (i32, i32) {
    %c0_i32 = arith.constant 0 : i32
    %c0_i32_0 = arith.constant 0 : i32
    %c0_i32_1 = arith.constant 0 : i32
    return %c0_i32, %c0_i32_0 : i32, i32
  }
  func.func @transform_24(%arg0: i32) -> (i32, i32, i32) {
    %c0_i32 = arith.constant 0 : i32
    %c0_i32_0 = arith.constant 0 : i32
    %c0_i32_1 = arith.constant 0 : i32
    return %arg0, %c0_i32, %c0_i32_0 : i32, i32, i32
  }
  func.func @transform_25(%arg0: i32) -> (i32, i32, i32) {
    %c0_i32 = arith.constant 0 : i32
    %c0_i32_0 = arith.constant 0 : i32
    %c0_i32_1 = arith.constant 0 : i32
    return %arg0, %c0_i32, %c0_i32_0 : i32, i32, i32
  }
  func.func @transform_26(%arg0: i32) -> (i32, i32, i32) {
    %c0_i32 = arith.constant 0 : i32
    %c0_i32_0 = arith.constant 0 : i32
    %c0_i32_1 = arith.constant 0 : i32
    return %arg0, %c0_i32, %c0_i32_0 : i32, i32, i32
  }
  func.func @transform_27(%arg0: i32) -> (i32, i32, i32) {
    %c0_i32 = arith.constant 0 : i32
    %c0_i32_0 = arith.constant 0 : i32
    %c0_i32_1 = arith.constant 0 : i32
    return %arg0, %c0_i32, %c0_i32_0 : i32, i32, i32
  }
  func.func @transform_28(%arg0: i32) -> (i32, i32, i32) {
    %c0_i32 = arith.constant 0 : i32
    %c0_i32_0 = arith.constant 0 : i32
    %c0_i32_1 = arith.constant 0 : i32
    return %arg0, %c0_i32, %c0_i32_0 : i32, i32, i32
  }
}

</mosaic_0001>

<bundles_post_ra>
// kernel: tpu_custom_call.1
= control target key start
LH: loop header
LB: loop body
LE: loop exit
PB: predicated region body
PF: predicated region fallthrough
CT: control target
= control target key end

     0   :  { %s5106_s0 = inlined_call_operand.hbm [shape: f32[2,8,32], index: 0, kind: input, shape index: {}]   ;;  %s5107_s1 = inlined_call_operand.hbm [shape: f32[2,8,32], index: 1, kind: input, shape index: {}]   ;;  %s5108_s2 = inlined_call_operand.hbm [shape: f32[2,8,8], index: 2, kind: input, shape index: {}]   ;;  %s5109_s3 = inlined_call_operand.hbm [shape: f32[2,8,8], index: 3, kind: input, shape index: {}]   ;;  %s5110_s4 = inlined_call_operand.vmem [shape: f32[32,96], index: 4, kind: input, shape index: {}]   ;;  %s5111_s5 = inlined_call_operand.vmem [shape: f32[1,96], index: 5, kind: input, shape index: {}]   ;;  %s5112_s6 = inlined_call_operand.vmem [shape: f32[32,32], index: 6, kind: input, shape index: {}]   ;;  %s5113_s7 = inlined_call_operand.vmem [shape: f32[1,32], index: 7, kind: input, shape index: {}]   ;;  %s5114_s8 = inlined_call_operand.vmem [shape: f32[1,32], index: 8, kind: input, shape index: {}]   ;;  %s5115_s9 = inlined_call_operand.vmem [shape: f32[1,32], index: 9, kind: input, shape index: {}]   ;;  %s5116_s10 = inlined_call_operand.vmem [shape: f32[32,32], index: 10, kind: input, shape index: {}]   ;;  %s5117_s11 = inlined_call_operand.vmem [shape: f32[1,32], index: 11, kind: input, shape index: {}]   ;;  %s5118_s12 = inlined_call_operand.hbm [shape: f32[32,64], index: 12, kind: input, shape index: {}]   ;;  %s5119_s13 = inlined_call_operand.vmem [shape: f32[1,64], index: 13, kind: input, shape index: {}]   ;;  %s5120_s14 = inlined_call_operand.hbm [shape: f32[32,32], index: 14, kind: input, shape index: {}]   ;;  %s5121_s15 = inlined_call_operand.vmem [shape: f32[1,32], index: 15, kind: input, shape index: {}]   ;;  %s5122_s16 = inlined_call_operand.vmem [shape: f32[1,32], index: 16, kind: input, shape index: {}]   ;;  %s5123_s17 = inlined_call_operand.vmem [shape: f32[1,32], index: 17, kind: input, shape index: {}]   ;;  %s5124_s18 = inlined_call_operand.hbm [shape: f32[32,64], index: 18, kind: input, shape index: {}]   ;;  %s5125_s19 = inlined_call_operand.vmem [shape: f32[1,64], index: 19, kind: input, shape index: {}]   ;;  %s5126_s20 = inlined_call_operand.vmem [shape: f32[64,32], index: 20, kind: input, shape index: {}]   ;;  %s5127_s21 = inlined_call_operand.vmem [shape: f32[1,32], index: 21, kind: input, shape index: {}]   ;;  %s5128_s22 = inlined_call_operand.vmem [shape: f32[1,32], index: 22, kind: input, shape index: {}]   ;;  %s5129_s23 = inlined_call_operand.vmem [shape: f32[1,32], index: 23, kind: input, shape index: {}]   ;;  %s5130_s24 = inlined_call_operand.hbm [shape: f32[2,8,32], index: 24, kind: output, shape index: {0}]   ;;  %s5131_s25 = inlined_call_operand.hbm [shape: f32[2,8,32], index: 25, kind: output, shape index: {1}]   ;;  %s5132_s26 = inlined_call_operand.hbm [shape: f32[2,8,32], index: 26, kind: output, shape index: {2}]   ;;  %s5133_s27 = inlined_call_operand.hbm [shape: f32[2,8,32], index: 27, kind: output, shape index: {3}]   ;;  %s5134_s28 = inlined_call_operand.hbm [shape: f32[2,8,32], index: 28, kind: output, shape index: {4}]  }
   0x1   :  { %5173 = sst [smem:[#allocation35_spill]] %s5106_s0 }
   0x2   :  { %5174 = sst [smem:[#allocation36_spill]] %s5107_s1 }
   0x3   :  { %5175 = sst [smem:[#allocation37_spill]] %s5108_s2 }
   0x4   :  { %5176 = sst [smem:[#allocation38_spill]] %s5109_s3 }
   0x5   :  { %5177 = sst [smem:[#allocation39_spill]] %s5110_s4 }
   0x6   :  { %5178 = sst [smem:[#allocation40_spill]] %s5111_s5 }
   0x7   :  { %5179 = sst [smem:[#allocation41_spill]] %s5112_s6 }
   0x8   :  { %5180 = sst [smem:[#allocation42_spill]] %s5113_s7 }
   0x9   :  { %5181 = sst [smem:[#allocation43_spill]] %s5114_s8 }
   0xa   :  { %5182 = sst [smem:[#allocation44_spill]] %s5115_s9 }
   0xb   :  { %5183 = sst [smem:[#allocation45_spill]] %s5116_s10 }
   0xc   :  { %5184 = sst [smem:[#allocation46_spill]] %s5117_s11 }
   0xd   :  { %5185 = sst [smem:[#allocation47_spill]] %s5118_s12 }
   0xe   :  { %5186 = sst [smem:[#allocation48_spill]] %s5119_s13 }
   0xf   :  { %5187 = sst [smem:[#allocation49_spill]] %s5120_s14 }
  0x10   :  { %5188 = sst [smem:[#allocation50_spill]] %s5121_s15 }
  0x11   :  { %5189 = sst [smem:[#allocation51_spill]] %s5122_s16 }
  0x12   :  { %5190 = sst [smem:[#allocation52_spill]] %s5123_s17 }
  0x13   :  { %5191 = sst [smem:[#allocation53_spill]] %s5124_s18 }
  0x14   :  { %5192 = sst [smem:[#allocation54_spill]] %s5126_s20 }
  0x15   :  { %5193 = sst [smem:[#allocation55_spill]] %s5127_s21 }
  0x16   :  { %5194 = sst [smem:[#allocation56_spill]] %s5128_s22 }
  0x17   :  { %5195 = sst [smem:[#allocation57_spill]] %s5129_s23 }
  0x18   :  { %5196 = sst [smem:[#allocation58_spill]] %s5130_s24 }
  0x19   :  { %5197 = sst [smem:[#allocation59_spill]] %s5131_s25 }
  0x1a   :  { %5198 = sst [smem:[#allocation60_spill]] %s5132_s26 }
  0x1b   :  { %5199 = sst [smem:[#allocation61_spill]] %s5133_s27 }
  0x1c   :  { %5200 = sst [smem:[#allocation62_spill]] %s5134_s28 }
  0x1d   :  { %34 = vsyncpa [#allocation3], 0 }
  0x1e   :  { %36 = vsyncpa [#allocation3 + $0x1], 0 }
  0x1f   :  { %37 = vsyncpa [#allocation6], 0 }
  0x20   :  { %39 = vsyncpa [#allocation6 + $0x1], 0 }
  0x21   :  { %40 = vsyncpa [#allocation9], 0 }
  0x22   :  { %42 = vsyncpa [#allocation9 + $0x1], 0 }
  0x23   :  { %43 = vsyncpa [#allocation12], 0 }
  0x24   :  { %44 = vsyncpa [#allocation4], 0 }
  0x25   :  { %46 = vsyncpa [#allocation4 + $0x1], 0 }
  0x26   :  { %47 = vsyncpa [#allocation16], 0 }
  0x27   :  { %49 = vsyncpa [#allocation16 + $0x1], 0 }
  0x28   :  { %50 = vsyncpa [#allocation19], 0 }
  0x29   :  { %52 = vsyncpa [#allocation19 + $0x1], 0  ;;  %s4130_s8 = smov 0   ;;  %s4132_s5 = smov 0  }
  0x2a   :  { %s4134_s9 = smov 0   ;;  %s4136_s30 = smov 0  }
  0x2b LB: > { %5201 = sst [smem:[#allocation29_spill]] %s3955_s8  ;;  %s4151_s3 = sadd.s32 4294967295, %s3967_s30   ;;  %s3967_s30 = sphi %s4136_s30, %s5263_s30   ;;  %s3963_s9 = sphi %s4134_s9, %s5265_s9   ;;  %s3959_s5 = sphi %s4132_s5, %s5267_s5   ;;  %s3955_s8 = sphi %s4130_s8, %s5266_s8  }
  0x2c   : > { %5202 = sst [smem:[#allocation30_spill]] %s3963_s9  ;;  %s5142_s6 = sadd.s32 4294967294, %s3967_s30  }
  0x2d   : > { %p78_p0 = scmp.ne.s32.totalorder %s3959_s5, %s3955_s8  ;;  %p5155_p1 = scmp.eq.s32.totalorder %s4151_s3, 0 }
  0x2e   : > { %p600_p2 = scmp.eq.s32.totalorder %s4151_s3, 1  ;;  %p606_p3 = scmp.eq.s32.totalorder %s5142_s6, 1 }
  0x2f   : > { %p4162_p4 = por %p5155_p1, %p78_p0  ;;  %p3295_p5 = scmp.ge.s32.totalorder %s3967_s30, 1 }
  0x30   : > { %p4167_p6 = por %p606_p3, %p78_p0  ;;  %p717_p7 = scmp.lt.s32.totalorder %s3967_s30, 3 }
  0x31   : > { %s5206_s2 = sld [smem:[#allocation47_spill]]  ;;  %s3969_s1 = smov [#allocation10]  }
  0x32   : > { %s5204_s0 = scalar_select %p4167_p6, 1, 0 }
  0x33   : > { %p4175_p8 = pnand %p3295_p5, %p717_p7  ;;  %s754_s4 = sshll.u32 %s3969_s1, 4  ;;  %s755_s4 = int_to_ptr.vmem [resolvable:$true] %s754_s4 }
  0x34   : > { %5205 = sst [smem:[#allocation31_spill]] %s5204_s0  ;;  %s5145_s1 = smov 128  }
  0x35   : > { %p3395_p9 = pneg %p4175_p8  ;;  %s5209_s14 = sld [smem:[#allocation49_spill]] }
  0x36   : > { %s5146_s0 = smov 8   ;;  %s3972_s8 = smov [#allocation11]  }
  0x37   : > { %s752_s7 = sshll.u32 %s5206_s2, 4  ;;  %p4183_p10 = pnand %p3395_p9, %p5155_p1  ;;  %s753_s7 = int_to_ptr.hbm [resolvable:$true] %s752_s7 }
  0x38   : > { %s771_s23 = sshll.u32 %s3972_s8, 4  ;;  %s4202_s29 = sadd.s32 1, %s3967_s30   ;;  %s772_s23 = int_to_ptr.vmem [resolvable:$true] %s771_s23 }
  0x39   : > { %3398 = dma.hbm_to_vmem [thread:$0]  (!%p4183_p10), %s753_s7, 512, %s755_s4, [#allocation9], %s5145_s1, %s5145_s1, %s5146_s0  }
  0x3a   : > { %5210 = sst [smem:[#allocation32_spill]] %s4202_s29  ;;  %s65_s2 = sadd.s32 1, %s3963_s9 }
  0x3b   : > { %s769_s6 = sshll.u32 %s5209_s14, 4  ;;  %s62_s14 = ssub.s32 %s3967_s30, %s4202_s29  ;;  %s770_s6 = int_to_ptr.hbm [resolvable:$true] %s769_s6 }
  0x3c   : > { %3401 = dma.hbm_to_vmem [thread:$0]  (!%p4183_p10), %s770_s6, 512, %s772_s23, [#allocation12], %s5145_s1, %s5145_s1, %s5146_s0  }
  0x3d   : > { %p72_p12 = scmp.ne.s32.totalorder %s3963_s9, %s3959_s5  ;;  %p63_p13 = scmp.eq.s32.totalorder %s62_s14, 0 }
  0x3e   : > { %p73_p0 = scmp.eq.s32.totalorder %s3967_s30, 0  ;;  %p3437_p5 = scmp.lt.s32.totalorder %s3967_s30, 2 }
  0x3f   : > { %p4212_p3 = por %p600_p2, %p72_p12  ;;  %s5151_s4 = sand.u32 1, %s3963_s9  }
  0x40   : > { %s4218_s8 = scalar_select %p63_p13, %s3963_s9, %s65_s2  }
  0x41   : > { %s5211_s7 = scalar_select %p4212_p3, 1, 0 }
  0x42   : > { %5213 = sst [smem:[#allocation34_spill]] %s4218_s8  ;;  %p74_p7 = por %p73_p0, %p72_p12 }
  0x43   : > { %5212 = sst [smem:[#allocation33_spill]] %s5211_s7  ;;  %s4223_s23 = sshll.u32 %s5151_s4, 3 }
  0x44   : > { %s4226_s6 = sshll.u32 %s3967_s30, 3  ;;  %p4228_p9 = pnand %p3437_p5, %p74_p7 }
  0x45   : > { %s5156_s1 = sand.u32 1, %s3967_s30   ;;  %s5215_s2 = sld [smem:[#allocation36_spill]] }
  0x46   : > { %s846_s22 = scalar_lea.vmem [#allocation5], %s4223_s23  ;;  %s4240_s4 = scalar_lea.sflag [#allocation6], %s5156_s1 }
  0x47   : > { %s854_s28 = sshll.u32 %s846_s22, 4  ;;  %p3619_p12 = pneg %p4228_p9  ;;  %s855_s28 = int_to_ptr.vmem [resolvable:$true] %s854_s28 }
  0x4b   : > { %s850_s8 = scalar_lea.hbm %s5215_s2, %s4226_s6 }
  0x4c   : > { %s852_s24 = sshll.u32 %s850_s8, 4  ;;  %s3622_s8 = scalar_lea.hbm %s5215_s2, 16  ;;  %s853_s24 = int_to_ptr.hbm [resolvable:$true] %s852_s24 }
  0x4d   : > { %s3615_s26 = sshra.s32 %s853_s24, 4  ;;  %s3616_s26 = int_to_ptr.hbm [resolvable:$true] %s3615_s26 }
  0x4e   : > { %s3617_s27 = scalar_lea.hbm %s3616_s26, 8  ;;  %p3623_p5 = scmp.lt.s32.totalorder %s3616_s26, %s5215_s2 }
  0x4f   : > { %p3618_p2 = scmp.ne.s32.totalorder %s3616_s26, %s3617_s27  ;;  %p3624_p7 = scmp.lt.s32.totalorder %s3622_s8, %s3617_s27 }
  0x51   : > { %p3620_p13 = pnand %p3619_p12, %p3618_p2  ;;  %p3625_p11 = por %p3624_p7, %p3623_p5 }
  0x53   : > { %p3621_p0 = pneg %p3620_p13 }
  0x55   : > { %p3626_p1 = pnand %p3625_p11, %p3621_p0 }
  0x57   : > { %3629 = shalt.err (!%p3626_p1)
}
  0x58   : > { %3411 = dma.hbm_to_vmem [thread:$0]  (!%p4228_p9), %s853_s24, 128, %s855_s28, %s4240_s4  }
  0x59   : > { %s5216_s18 = sld [smem:[#allocation53_spill]]  ;;  %s3973_s25 = smov [#allocation13]  }
  0x5a   : > { %s794_s26 = sshll.u32 %s3973_s25, 4  ;;  %s5217_s27 = smov 8   ;;  %s795_s26 = int_to_ptr.vmem [resolvable:$true] %s794_s26 }
  0x5b   : > { %s5218_s29 = smov 128   ;;  %s5219_s2 = sld [smem:[#allocation35_spill]] }
  0x5c   : > { %s827_s20 = scalar_lea.vmem [#allocation2], %s4223_s23  ;;  %s5220_s1 = sand.u32 1, %s3963_s9  }
  0x5d   : > { %s835_s24 = sshll.u32 %s827_s20, 4  ;;  %s824_s7 = scalar_lea.sflag [#allocation3], %s5220_s1  ;;  %s836_s24 = int_to_ptr.vmem [resolvable:$true] %s835_s24 }
  0x5f   : > { %s792_s0 = sshll.u32 %s5216_s18, 4  ;;  %s793_s0 = int_to_ptr.hbm [resolvable:$true] %s792_s0 }
  0x60   : > { %3404 = dma.hbm_to_vmem [thread:$0]  (!%p4183_p10), %s793_s0, 512, %s795_s26, [#allocation12], %s5218_s29, %s5218_s29, %s5217_s27  }
  0x61   : > { %s831_s21 = scalar_lea.hbm %s5219_s2, %s4226_s6  ;;  %s3682_s26 = scalar_lea.hbm %s5219_s2, 16 }
  0x62   : > { %s833_s28 = sshll.u32 %s831_s21, 4  ;;  %s834_s28 = int_to_ptr.hbm [resolvable:$true] %s833_s28 }
  0x63   : > { %s3675_s18 = sshra.s32 %s834_s28, 4  ;;  %s3676_s18 = int_to_ptr.hbm [resolvable:$true] %s3675_s18 }
  0x64   : > { %s3677_s25 = scalar_lea.hbm %s3676_s18, 8  ;;  %p3683_p10 = scmp.lt.s32.totalorder %s3676_s18, %s5219_s2 }
  0x65   : > { %p3678_p1 = scmp.ne.s32.totalorder %s3676_s18, %s3677_s25  ;;  %p3684_p13 = scmp.lt.s32.totalorder %s3682_s26, %s3677_s25 }
  0x67   : > { %p3680_p11 = pnand %p3678_p1, %p3619_p12  ;;  %p3685_p0 = por %p3684_p13, %p3683_p10 }
  0x69   : > { %p3681_p2 = pneg %p3680_p11 }
  0x6b   : > { %p3686_p5 = pnand %p3685_p0, %p3681_p2 }
  0x6d   : > { %3689 = shalt.err (!%p3686_p5)
}
  0x6e   : > { %3408 = dma.hbm_to_vmem [thread:$0]  (!%p4228_p9), %s834_s28, 128, %s836_s24, %s824_s7  }
  0x6f   : > { %s5221_s8 = sld [smem:[#allocation37_spill]]  ;;  %s865_s11 = scalar_lea.vmem [#allocation7], %s4223_s23 }
  0x70   : > { %s873_s0 = sshll.u32 %s865_s11, 4  ;;  %s874_s0 = int_to_ptr.vmem [resolvable:$true] %s873_s0 }
  0x75   : > { %s5222_s22 = smov %s5221_s8  ;;  %s869_s1 = scalar_lea.hbm %s5221_s8, %s4226_s6 }
  0x76   : > { %s871_s9 = sshll.u32 %s869_s1, 4  ;;  %s3712_s24 = scalar_lea.hbm %s5222_s22, 16  ;;  %s872_s9 = int_to_ptr.hbm [resolvable:$true] %s871_s9 }
  0x77   : > { %s3705_s18 = sshra.s32 %s872_s9, 4  ;;  %s3706_s18 = int_to_ptr.hbm [resolvable:$true] %s3705_s18 }
  0x78   : > { %s3707_s25 = scalar_lea.hbm %s3706_s18, 8  ;;  %p3713_p2 = scmp.lt.s32.totalorder %s3706_s18, %s5222_s22 }
  0x79   : > { %p3708_p7 = scmp.ne.s32.totalorder %s3706_s18, %s3707_s25  ;;  %p3714_p10 = scmp.lt.s32.totalorder %s3712_s24, %s3707_s25 }
  0x7b   : > { %p3710_p1 = pnand %p3708_p7, %p3619_p12  ;;  %p3715_p13 = por %p3714_p10, %p3713_p2 }
  0x7d   : > { %p3711_p11 = pneg %p3710_p1 }
  0x7f   : > { %p3716_p0 = pnand %p3715_p13, %p3711_p11 }
  0x81   : > { %3719 = shalt.err (!%p3716_p0)
}
  0x82   : > { %3414 = dma.hbm_to_vmem [thread:$0]  (!%p4228_p9), %s872_s9, 128, %s874_s0, %s4240_s4  }
  0x83   : > { %s5223_s21 = sld [smem:[#allocation38_spill]]  ;;  %s884_s1 = scalar_lea.vmem [#allocation8], %s4223_s23 }
  0x84   : > { %s892_s11 = sshll.u32 %s884_s1, 4  ;;  %s5224_s18 = sand.u32 1, %s3967_s30   ;;  %s893_s11 = int_to_ptr.vmem [resolvable:$true] %s892_s11 }
  0x85   : > { %s881_s25 = scalar_lea.sflag [#allocation9], %s5224_s18 }
  0x89   : > { %s888_s8 = scalar_lea.hbm %s5223_s21, %s4226_s6  ;;  %s3742_s0 = scalar_lea.hbm %s5223_s21, 16 }
  0x8a   : > { %s890_s26 = sshll.u32 %s888_s8, 4  ;;  %s891_s26 = int_to_ptr.hbm [resolvable:$true] %s890_s26 }
  0x8b   : > { %s3735_s27 = sshra.s32 %s891_s26, 4  ;;  %s3736_s27 = int_to_ptr.hbm [resolvable:$true] %s3735_s27 }
  0x8c   : > { %s3737_s24 = scalar_lea.hbm %s3736_s27, 8  ;;  %p3743_p11 = scmp.lt.s32.totalorder %s3736_s27, %s5223_s21 }
  0x8d   : > { %p3738_p5 = scmp.ne.s32.totalorder %s3736_s27, %s3737_s24  ;;  %p3744_p2 = scmp.lt.s32.totalorder %s3742_s0, %s3737_s24 }
  0x8f   : > { %p3740_p7 = pnand %p3738_p5, %p3619_p12  ;;  %p3745_p10 = por %p3744_p2, %p3743_p11 }
  0x91   : > { %p3741_p1 = pneg %p3740_p7 }
  0x93   : > { %p3746_p13 = pnand %p3745_p10, %p3741_p1 }
  0x95   : > { %3749 = shalt.err (!%p3746_p13)
}
  0x96   : > { %3417 = dma.hbm_to_vmem [thread:$0]  (!%p4228_p9), %s891_s26, 128, %s893_s11, %s881_s25  }
  0x97   : > { %901 = sbr.rel (%p4175_p8) target bundleno = 3643 (0xe3b), region = 116  ;;  %s4320_s28 = sand.u32 (!%p4175_p8), 1, %s3959_s5  }
  0x98   : > { %s4323_s7 = sshll.u32 (!%p4175_p8), %s4320_s28, 3  ;;  %s904_s29 = scalar_lea.sflag (!%p4175_p8), [#allocation3], %s4320_s28 }
  0x99   : > { %s907_s20 = scalar_lea.vmem (!%p4175_p8), [#allocation2], %s4323_s7 }
  0x9c   : > { %3922 = dma.done.wait (%p4162_p4), %s904_s29, 128  }
  0x9d   : > { %3924 = vsyncadd (%p4162_p4), %s904_s29, 4294967168  ;;  %s4332_s12 = sand.u32 1, %s4151_s3   ;;  %s917_s8 = scalar_lea.vmem [#allocation5], %s4323_s7 }
  0x9e   : > { %s914_s14 = scalar_lea.sflag [#allocation6], %s4332_s12 }
  0x9f   : > { %3926 = dma.done.wait (%p4162_p4), %s914_s14, 256  }
  0xa0   : > { %3928 = vsyncadd (%p4162_p4), %s914_s14, 4294967040  ;;  %s927_s1 = scalar_lea.vmem [#allocation7], %s4323_s7  ;;  %s934_s11 = scalar_lea.sflag [#allocation9], %s4332_s12 }
  0xa1   : > { %s937_s26 = scalar_lea.vmem [#allocation8], %s4323_s7 }
  0xa2   : > { %3930 = dma.done.wait (%p4162_p4), %s934_s11, 128  }
  0xa3   : > { %3932 = vsyncadd (%p4162_p4), %s934_s11, 4294967168  ;;  %p5225_p8 = scmp.eq.s32.totalorder %s4151_s3, 0 }
  0xa5   : > { %3934 = dma.done.wait (%p5225_p8), [#allocation9], 512   ;;  %p5226_p9 = pmov %p5225_p8 }
  0xa6   : > { %p5227_p12 = pmov %p5225_p8 }
  0xa7   : > { %3936 = vsyncadd (%p5226_p9), [#allocation9], 4294966784 }
  0xa8   : > { %3938 = dma.done.wait (%p5227_p12), [#allocation12], 1024   ;;  %p5228_p0 = pmov %p5225_p8 }
  0xa9   : > { %s5229_s27 = sld [smem:[#allocation39_spill]]  ;;  %vm1073_vm0 = vcmask 261120   ;;  %v4367_v4 = vld [vmem:[%s907_s20] sm:$0xff]  ;;  %s3974_s11 = smov 96   ;;  %v3978_v14 = vmov 1983009808  }
  0xaa   : > { %3940 = vsyncadd (%p5228_p0), [#allocation12], 4294966272  ;;  %s5230_s14 = sld [smem:[#allocation40_spill]]  ;;  %s3975_s20 = smov 120   ;;  %v1123_v15 = vunpack.c.l.s4 %v3978_v14  ;;  %vm1118_vm1 = vcmask 1047556   ;;  %vm1472_vm2 = vcmask 64512  }
  0xab   : > { %s3976_s18 = smov 112   ;;  %s3977_s25 = smov 104   ;;  %v3979_v23 = vmov 1934713408   ;;  %vm1836_vm3 = vcmask 130048   ;;  %vm1838_vm4 = vcmask 195584  }
  0xac   : > { %s5163_s24 = scalar_lea.vmem [#allocation15], %s4323_s7  ;;  %v4404_v19 = vunpack.c.0.s8 %v1123_v15  ;;  %v1147_v24 = vunpack.c.l.s4 %v3979_v23  ;;  %s5162_s9 = scalar_lea.vmem [#allocation17], %s4323_s7 }
  0xad   : > { %s5165_s10 = smov 16   ;;  %s5164_s4 = smov 24  }
  0xae   : > { %v4410_v29 = vunpack.c.0.s8 %v1147_v24  ;;  %s3983_s0 = smov 8   ;;  %s5231_s29 = sld [smem:[#allocation41_spill]] }
  0xaf   : > { %v1068_v0 = vld [vmem:[%s5229_s27 + $0x18] sm:$0xff]  ;;  %v1067_v1 = vld [vmem:[%s5229_s27 + $0x10] sm:$0xff]  ;;  %v1066_v2 = vld [vmem:[%s5229_s27 + $0x8] sm:$0xff]  ;;  %s5233_s13 = sld [smem:[#allocation48_spill]]  ;;  %s5167_s6 = scalar_lea.vmem [#allocation18], %s4323_s7 }
  0xb0   : > { %1089 = vmatpush.msra.mxu0 %v1068_v0  ;;  %v1065_v3 = vld [vmem:[%s5229_s27] sm:$0xff]  ;;  %s5240_s15 = sld [smem:[#allocation50_spill]] }
  0xb1   : > { %v3500_v5 = vld [vmem:[%s5230_s14] ss:$0 sm:$0xff]  ;;  %s5234_s14 = sld [smem:[#allocation45_spill]] }
  0xb2   : > { %1090 = vmatpush.msra.mxu0 %v1067_v1  ;;  %s5241_s16 = sld [smem:[#allocation51_spill]] }
  0xb3   : > { %s5242_s17 = sld [smem:[#allocation52_spill]] }
  0xb4   : > { %1091 = vmatpush.msra.mxu0 %v1066_v2 }
  0xb6   : > { %1092 = vmatpush.msra.mxu0 %v1065_v3 }
  0xb7   : > { %3321 = vmatmul.msk.f32.vlgmr.msra.gmra.mxu0 %vm1073_vm0, %v4367_v4 }
 0x134   : > { %v1094_v6 = vpop.f32.mrf.mxu0 }
 0x135   : > { %v4374_v7 = vadd.f32 %v3500_v5, %v1094_v6 }
 0x137   : > { %1099 = vrot.lane.b32.xlu2 %v4374_v7, %s3974_s11  ;;  %1228 = vrot.lane.b32.xlu1 %v4374_v7, %s3975_s20  ;;  %v1097_v8 = vmul.f32 0.35355338, %v4374_v7 }
 0x138   : > { %1230 = vrot.lane.b32.xlu0 %v4374_v7, %s3976_s18 }
 0x139   : > { %v1120_v18 = vrot.slane %v1097_v8, 4 }
 0x140   : > { %1232 = vrot.lane.b32.xlu0 %v4374_v7, %s3977_s25 }
 0x148   : > { %1111 = vrot.lane.b32.xlu0 %v1097_v8, %s3976_s18 }
 0x150   : > { %1108 = vrot.lane.b32.xlu0 %v1097_v8, %s3975_s20 }
 0x191   : > { %v1100_v9 = vpop.permute.xlu2 %1099 }
 0x192   : > { %1102 = vst.msk [vmem:[%s5163_s24] sm:$0xff] %vm1073_vm0, %v1100_v9  ;;  %v1245_v50 = vrot.slane %v1100_v9, 4  ;;  %s5235_s24 = sld [smem:[#allocation43_spill]] }
 0x1a9   : > { %v4395_v11 = vpop.permute.xlu1 %1228 }
 0x1aa   : > { %v4391_v10 = vpop.permute.xlu0 %1230 }
 0x1ab   : > { %1236 = vrot.lane.b32.xlu1 %v4391_v10, %s3974_s11 }
 0x1b2   : > { %v4397_v12 = vpop.permute.xlu0 %1232 }
 0x1b3   : > { %1234 = vrot.lane.b32.xlu1 %v4395_v11, %s3974_s11  ;;  %1238 = vrot.lane.b32.xlu2 %v4397_v12, %s3974_s11 }
 0x1ba   : > { %v1112_v13 = vpop.permute.xlu0 %1111 }
 0x1bb   : > { %1114 = vrot.lane.b32.xlu2 %v1097_v8, %s3977_s25  ;;  %v1117_v17 = vrot.slane %v1112_v13, 4  ;;  %v1121_v20 = vsel %vm1118_vm1, %v1112_v13, %v1120_v18 }
 0x1bc   : > { %v1129_v25 = vperm.slane %v1121_v20, %v4404_v19 }
 0x1bd   : > { %v1119_v22 = vsel %vm1118_vm1, %v1117_v17, %v1097_v8 }
 0x1be   : > { %v1125_v27 = vperm.slane %v1119_v22, %v4404_v19  ;;  %v1156_v32 = vrot.slane %v1129_v25, 4 }
 0x1c0   : > { %v1144_v35 = vrot.slane %v1125_v27, 4 }
 0x1c2   : > { %v1109_v21 = vpop.permute.xlu0 %1108 }
 0x1c3   : > { %v1132_v26 = vrot.slane %v1109_v21, 4 }
 0x20d   : > { %v1239_v16 = vpop.permute.xlu2 %1238 }
 0x20e   : > { %v1255_v61 = vrot.slane %v1239_v16, 4 }
 0x215   : > { %v1115_v28 = vpop.permute.xlu2 %1114 }
 0x216   : > { %v1130_v30 = vrot.slane %v1115_v28, 4  ;;  %v1133_v31 = vsel %vm1118_vm1, %v1115_v28, %v1132_v26 }
 0x217   : > { %v1141_v33 = vperm.slane %v1133_v31, %v4404_v19 }
 0x218   : > { %v1131_v34 = vsel %vm1118_vm1, %v1130_v30, %v1109_v21 }
 0x219   : > { %v1137_v36 = vperm.slane %v1131_v34, %v4404_v19  ;;  %v1154_v37 = vrot.slane %v1141_v33, 4  ;;  %v1157_v38 = vsel %vm1118_vm1, %v1141_v33, %v1156_v32 }
 0x21a   : > { %v1165_v39 = vperm.slane %v1157_v38, %v4410_v29 }
 0x21b   : > { %v1142_v40 = vrot.slane %v1137_v36, 4  ;;  %v1145_v41 = vsel %vm1118_vm1, %v1137_v36, %v1144_v35  ;;  %v1155_v42 = vsel %vm1118_vm1, %v1154_v37, %v1129_v25 }
 0x21c   : > { %v1153_v43 = vperm.slane %v1145_v41, %v4410_v29  ;;  %v1161_v45 = vperm.slane %v1155_v42, %v4410_v29  ;;  %v1172_v46 = vrot.slane %v1165_v39, 4 }
 0x21d   : > { %v1143_v44 = vsel %vm1118_vm1, %v1142_v40, %v1125_v27  ;;  %v1237_v47 = vpop.permute.xlu1 %1236 }
 0x21e   : > { %v1149_v48 = vperm.slane %v1143_v44, %v4410_v29  ;;  %v1168_v49 = vrot.slane %v1153_v43, 4  ;;  %v1243_v51 = vrot.slane %v1237_v47, 4  ;;  %v1170_v54 = vrot.slane %v1161_v45, 4 }
 0x21f   : > { %v1173_v55 = vsel %vm1118_vm1, 0.0, %v1172_v46  ;;  %v1246_v57 = vsel %vm1118_vm1, %v1237_v47, %v1245_v50 }
 0x220   : > { %v1166_v52 = vrot.slane %v1149_v48, 4  ;;  %v1169_v53 = vsel %vm1118_vm1, 0.0, %v1168_v49  ;;  %v1244_v56 = vsel %vm1118_vm1, %v1243_v51, %v1100_v9  ;;  %v1190_v62 = vrot.slane %v1173_v55, 4 }
 0x221   : > { %v1179_v58 = vrot.slane %v1169_v53, 4  ;;  %v1250_v60 = vperm.slane %v1244_v56, %v4404_v19  ;;  %v1254_v63 = vperm.slane %v1246_v57, %v4404_v19  ;;  %v1171_v0 = vsel %vm1118_vm1, 0.0, %v1170_v54 }
 0x222   : > { %v1167_v59 = vsel %vm1118_vm1, 0.0, %v1166_v52  ;;  %v1185_v9 = vsel %vm1118_vm1, %v1172_v46, %v1161_v45  ;;  %v1191_v15 = vsel %vm1118_vm1, %v1190_v62, %v1171_v0  ;;  %v1174_v23 = vsel %vm1118_vm1, %v1168_v49, %v1149_v48 }
 0x223   : > { %v1180_v5 = vsel %vm1118_vm1, %v1179_v58, %v1167_v59  ;;  %v1269_v6 = vrot.slane %v1250_v60, 4  ;;  %v1281_v13 = vrot.slane %v1254_v63, 4  ;;  %v1189_v24 = vperm.slane %v1185_v9, %v4404_v19 }
 0x224   : > { %v1184_v21 = vperm.slane %v1180_v5, %v4404_v19  ;;  %v1195_v27 = vperm.slane %v1191_v15, %v4404_v19  ;;  %v1178_v33 = vperm.slane %v1174_v23, %v4404_v19 }
 0x225   : > { %v1235_v1 = vpop.permute.xlu1 %1234  ;;  %v1210_v42 = vrot.slane %v1189_v24, 4 }
 0x226   : > { %v1256_v2 = vsel %vm1118_vm1, %v1255_v61, %v1235_v1  ;;  %v1257_v3 = vrot.slane %v1235_v1, 4  ;;  %v1196_v34 = vrot.slane %v1184_v21, 4  ;;  %v1208_v41 = vrot.slane %v1195_v27, 4 }
 0x227   : > { %v1262_v8 = vperm.slane %v1256_v2, %v4404_v19  ;;  %v1198_v56 = vrot.slane %v1178_v33, 4  ;;  %v1211_v57 = vsel %vm1118_vm1, %v1195_v27, %v1210_v42 }
 0x228   : > { %v1258_v14 = vsel %vm1118_vm1, %v1239_v16, %v1257_v3  ;;  %v1197_v50 = vsel %vm1118_vm1, %v1196_v34, %v1178_v33  ;;  %v1219_v3 = vperm.slane %v1211_v57, %v4410_v29 }
 0x229   : > { %v1266_v17 = vperm.slane %v1258_v14, %v4404_v19  ;;  %v1267_v18 = vrot.slane %v1262_v8, 4  ;;  %v1270_v20 = vsel %vm1118_vm1, %v1262_v8, %v1269_v6  ;;  %v1203_v62 = vperm.slane %v1197_v50, %v4410_v29 }
 0x22a   : > { %v1278_v22 = vperm.slane %v1270_v20, %v4410_v29  ;;  %v1199_v9 = vsel %vm1118_vm1, %v1184_v21, %v1198_v56  ;;  %v1224_v23 = vrot.slane %v1219_v3, 4 }
 0x22b   : > { %v1268_v25 = vsel %vm1118_vm1, %v1267_v18, %v1250_v60  ;;  %v1279_v26 = vrot.slane %v1266_v17, 4  ;;  %v1282_v16 = vsel %vm1118_vm1, %v1266_v17, %v1281_v13  ;;  %v1222_v20 = vrot.slane %v1203_v62, 4 }
 0x22c   : > { %v1274_v28 = vperm.slane %v1268_v25, %v4410_v29  ;;  %v1290_v30 = vperm.slane %v1282_v16, %v4410_v29  ;;  %v1293_v31 = vrot.slane %v1278_v22, 4  ;;  %v1207_v22 = vperm.slane %v1199_v9, %v4410_v29 }
 0x22d   : > { %v1280_v32 = vsel %vm1118_vm1, %v1279_v26, %v1254_v63  ;;  %v1209_v63 = vsel %vm1118_vm1, %v1208_v41, %v1189_v24 }
 0x22e   : > { %v1286_v35 = vperm.slane %v1280_v32, %v4410_v29  ;;  %v1291_v36 = vrot.slane %v1274_v28, 4  ;;  %v1294_v37 = vsel %vm1118_vm1, 0.0, %v1293_v31  ;;  %v1297_v38 = vrot.slane %v1290_v30, 4 }
 0x22f   : > { %v1299_v39 = vsel %vm1118_vm1, %v1293_v31, %v1274_v28  ;;  %v1304_v40 = vrot.slane %v1294_v37, 4  ;;  %v1215_v14 = vperm.slane %v1209_v63, %v4410_v29  ;;  %v1225_v30 = vsel %vm1118_vm1, %v1224_v23, %v1207_v22 }
 0x230   : > { %v1292_v43 = vsel %vm1118_vm1, 0.0, %v1291_v36  ;;  %v1295_v44 = vrot.slane %v1286_v35, 4  ;;  %v1298_v45 = vsel %vm1118_vm1, 0.0, %v1297_v38  ;;  %v1303_v46 = vperm.slane %v1299_v39, %v4404_v19 }
 0x231   : > { %v1315_v47 = vrot.slane %v1298_v45, 4  ;;  %v1305_v48 = vsel %vm1118_vm1, %v1304_v40, %v1292_v43  ;;  %v1310_v49 = vsel %vm1118_vm1, %v1297_v38, %v1286_v35  ;;  %v1220_v21 = vrot.slane %v1215_v14, 4  ;;  %v1063_v35 = vld [vmem:[%s927_s1] sm:$0xff]  ;;  %s3980_s1 = smov 64  }
 0x232   : > { %v1296_v51 = vsel %vm1118_vm1, 0.0, %v1295_v44  ;;  %v1309_v52 = vperm.slane %v1305_v48, %v4404_v19  ;;  %v1314_v53 = vperm.slane %v1310_v49, %v4404_v19  ;;  %v1323_v54 = vrot.slane %v1303_v46, 4 }
 0x233   : > { %v1316_v55 = vsel %vm1118_vm1, %v1315_v47, %v1296_v51  ;;  %v1223_v28 = vsel %vm1118_vm1, %v1215_v14, %v1222_v20  ;;  %v1221_v32 = vsel %vm1118_vm1, %v1220_v21, %v1203_v62  ;;  %v1226_v33 = vrot.slane %v1207_v22, 4 }
 0x234   : > { %v1320_v58 = vperm.slane %v1316_v55, %v4404_v19  ;;  %v1321_v59 = vrot.slane %v1309_v52, 4  ;;  %v1335_v60 = vrot.slane %v1314_v53, 4  ;;  %v1324_v61 = vsel %vm1118_vm1, %v1309_v52, %v1323_v54 }
 0x235   : > { %v1332_v6 = vperm.slane %v1324_v61, %v4410_v29  ;;  %v1227_v34 = vsel %vm1118_vm1, %v1219_v3, %v1226_v33  ;;  %v3490_v48 = vpack.i.bf16 %v4391_v10, %v4395_v11 }
 0x236   : > { %v1322_v0 = vsel %vm1118_vm1, %v1321_v59, %v1303_v46  ;;  %v1333_v1 = vrot.slane %v1320_v58, 4  ;;  %v1336_v2 = vsel %vm1118_vm1, %v1320_v58, %v1335_v60 }
 0x237   : > { %v1328_v5 = vperm.slane %v1322_v0, %v4410_v29  ;;  %v1344_v8 = vperm.slane %v1336_v2, %v4410_v29  ;;  %v1351_v16 = vrot.slane %v1332_v6, 4 }
 0x238   : > { %v1334_v13 = vsel %vm1118_vm1, %v1333_v1, %v1314_v53 }
 0x239   : > { %v1340_v15 = vperm.slane %v1334_v13, %v4410_v29  ;;  %v1347_v17 = vrot.slane %v1328_v5, 4  ;;  %v1349_v18 = vrot.slane %v1344_v8, 4  ;;  %v1352_v31 = vsel %vm1118_vm1, %v1344_v8, %v1351_v16 }
 0x23b   : > { %v1348_v24 = vsel %vm1118_vm1, %v1340_v15, %v1347_v17  ;;  %v1350_v25 = vsel %vm1118_vm1, %v1349_v18, %v1332_v6  ;;  %v1345_v26 = vrot.slane %v1340_v15, 4 }
 0x23c   : > { %3324 = vmatpush.xpose.msk.msra.mxu2 %vm1472_vm2, %v1348_v24  ;;  %3326 = vmatpush.xpose.msk.msrb.mxu0 %vm1472_vm2, %v1350_v25 }
 0x23d   : > { %v1346_v27 = vsel %vm1118_vm1, %v1345_v26, %v1328_v5 }
 0x23e   : > { %3322 = vmatpush.xpose.msk.msra.mxu1 %vm1472_vm2, %v1346_v27 }
 0x23f   : > { %3325 = vmatmul.msk.f32.vlgmr.msra.gmra.mxu2 %vm1472_vm2, %v1223_v28  ;;  %3327 = vmatmul.msk.f32.vlgmr.msrb.gmra.mxu0 %vm1472_vm2, %v1225_v30 }
 0x241   : > { %3323 = vmatmul.msk.f32.vlgmr.msra.gmra.mxu1 %vm1472_vm2, %v1221_v32 }
 0x242   : > { %3328 = vmatpush.xpose.msk.msrb.mxu1 %vm1472_vm2, %v1352_v31 }
 0x249   : > { %3329 = vmatmul.msk.f32.vlgmr.msrb.gmra.mxu1 %vm1472_vm2, %v1227_v34 }
 0x2bc   : > { %v1548_v36 = vpop.f32.mrf.mxu0 }
 0x2bd   : > { %v1549_v37 = vadd.f32 %v1548_v36, %v1063_v35 }
 0x2be   : > { %v1496_v38 = vpop.f32.mrf.mxu1 }
 0x2bf   : > { %v1497_v39 = vadd.f32 %v1496_v38, %v1063_v35  ;;  %v1583_v40 = vsel %vm1472_vm2, %v1549_v37, -inf }
 0x2c0   : > { %1584 = vmax.xlane.f32.xlu0 %v1583_v40 }
 0x2c1   : > { %v1577_v41 = vsel %vm1472_vm2, %v1497_v39, -inf }
 0x2c2   : > { %v1522_v42 = vpop.f32.mrf.mxu2  ;;  %1578 = vmax.xlane.f32.xlu1 %v1577_v41 }
 0x2c3   : > { %v1523_v43 = vadd.f32 %v1522_v42, %v1063_v35 }
 0x2c5   : > { %v1580_v44 = vsel %vm1472_vm2, %v1523_v43, -inf }
 0x2c6   : > { %1581 = vmax.xlane.f32.xlu2 %v1580_v44  ;;  %v1574_v45 = vpop.f32.mrf.mxu1 }
 0x2c7   : > { %v1575_v46 = vadd.f32 %v1574_v45, %v1063_v35 }
 0x2c9   : > { %v1586_v47 = vsel %vm1472_vm2, %v1575_v46, -inf }
 0x2ce   : > { %1587 = vmax.xlane.f32.xlu2 %v1586_v47 }
 0x2d4   : > { %1357 = vrot.lane.b32.xlu0 %v4397_v12, %s3980_s1 }
 0x2db   : > { %1103 = vrot.lane.b32.xlu1 %v4374_v7, %s3980_s1 }
 0x2e6   : > { %3491 = vrot.lane.b32.xlu2 %v3490_v48, %s3980_s1  ;;  %s5237_s1 = sld [smem:[#allocation46_spill]] }
 0x333   : > { %v1585_v49 = vpop.xlane.xlu0 %1584 }
 0x334   : > { %v1591_v50 = vsub.f32 %v1549_v37, %v1585_v49 }
 0x335   : > { %v1579_v51 = vpop.xlane.xlu1 %1578 }
 0x336   : > { %v1597_v52 = vmul.f32 1.442695, %v1591_v50  ;;  %v1589_v53 = vsub.f32 %v1497_v39, %v1579_v51 }
 0x338   : > { %3513 = vpow2.f32 %v1597_v52  ;;  %v1593_v54 = vmul.f32 1.442695, %v1589_v53 }
 0x339   : > { %v1582_v55 = vpop.xlane.xlu2 %1581 }
 0x33a   : > { %3515 = vpow2.f32 %v1593_v54  ;;  %v1590_v56 = vsub.f32 %v1523_v43, %v1582_v55 }
 0x33c   : > { %v1595_v57 = vmul.f32 1.442695, %v1590_v56 }
 0x33e   : > { %v4506_v58 = vpop.eup %3513  ;;  %3517 = vpow2.f32 %v1595_v57 }
 0x33f   : > { %v1607_v7 = vsel %vm1472_vm2, %v4506_v58, 0.0 }
 0x340   : > { %v4510_v12 = vpop.eup %3515  ;;  %1608 = vadd.xlane.f32.xlu2 %v1607_v7 }
 0x341   : > { %v1588_v10 = vpop.xlane.xlu2 %1587  ;;  %v1601_v11 = vsel %vm1472_vm2, %v4510_v12, 0.0 }
 0x342   : > { %v1592_v59 = vsub.f32 %v1575_v46, %v1588_v10  ;;  %1602 = vadd.xlane.f32.xlu1 %v1601_v11 }
 0x344   : > { %v4514_v60 = vpop.eup %3517  ;;  %v1599_v61 = vmul.f32 1.442695, %v1592_v59 }
 0x345   : > { %v1604_v62 = vsel %vm1472_vm2, %v4514_v60, 0.0 }
 0x346   : > { %3519 = vpow2.f32 %v1599_v61  ;;  %1605 = vadd.xlane.f32.xlu0 %v1604_v62  ;;  %v1358_v63 = vpop.permute.xlu0 %1357 }
 0x347   : > { %v1374_v1 = vrot.slane %v1358_v63, 4 }
 0x349   : > { %v3492_v0 = vpop.permute.xlu2 %3491 }
 0x34a   : > { %v3494_v2 = vunpack.i.h.bf16 %v3492_v0  ;;  %v3493_v3 = vunpack.i.l.bf16 %v3492_v0 }
 0x34c   : > { %v4518_v5 = vpop.eup %3519  ;;  %v1362_v6 = vrot.slane %v3494_v2, 4  ;;  %v1375_v8 = vsel %vm1118_vm1, %v1374_v1, %v3493_v3  ;;  %v1376_v9 = vrot.slane %v3493_v3, 4 }
 0x34d   : > { %v1381_v13 = vperm.slane %v1375_v8, %v4404_v19  ;;  %v1104_v14 = vpop.permute.xlu1 %1103  ;;  %v1610_v15 = vsel %vm1472_vm2, %v4518_v5, 0.0 }
 0x34e   : > { %v1377_v17 = vsel %vm1118_vm1, %v1358_v63, %v1376_v9  ;;  %1106 = vst.msk [vmem:[%s5162_s9] sm:$0xff] %vm1073_vm0, %v1104_v14  ;;  %v1363_v18 = vsel %vm1118_vm1, %v1362_v6, %v1104_v14  ;;  %v1364_v20 = vrot.slane %v1104_v14, 4  ;;  %1611 = vadd.xlane.f32.xlu1 %v1610_v15  ;;  %s5244_s9 = sld [smem:[#allocation55_spill]] }
 0x34f   : > { %v1385_v22 = vperm.slane %v1377_v17, %v4404_v19  ;;  %v1386_v23 = vrot.slane %v1381_v13, 4  ;;  %v1369_v24 = vperm.slane %v1363_v18, %v4404_v19 }
 0x350   : > { %v1365_v25 = vsel %vm1118_vm1, %v3494_v2, %v1364_v20 }
 0x351   : > { %v1398_v26 = vrot.slane %v1385_v22, 4  ;;  %v1373_v16 = vperm.slane %v1365_v25, %v4404_v19  ;;  %v1387_v21 = vsel %vm1118_vm1, %v1386_v23, %v1369_v24  ;;  %v1388_v27 = vrot.slane %v1369_v24, 4 }
 0x352   : > { %v1393_v28 = vperm.slane %v1387_v21, %v4410_v29 }
 0x353   : > { %v1389_v30 = vsel %vm1118_vm1, %v1381_v13, %v1388_v27  ;;  %v1399_v31 = vsel %vm1118_vm1, %v1398_v26, %v1373_v16  ;;  %v1400_v32 = vrot.slane %v1373_v16, 4 }
 0x354   : > { %v1397_v33 = vperm.slane %v1389_v30, %v4410_v29  ;;  %v1405_v34 = vperm.slane %v1399_v31, %v4410_v29  ;;  %v1410_v37 = vrot.slane %v1393_v28, 4 }
 0x355   : > { %v1401_v35 = vsel %vm1118_vm1, %v1385_v22, %v1400_v32 }
 0x356   : > { %v1409_v36 = vperm.slane %v1401_v35, %v4410_v29  ;;  %v1412_v38 = vrot.slane %v1397_v33, 4  ;;  %v1414_v40 = vrot.slane %v1405_v34, 4  ;;  %v1411_v45 = vsel %vm1118_vm1, 0.0, %v1410_v37 }
 0x358   : > { %v1413_v39 = vsel %vm1118_vm1, 0.0, %v1412_v38  ;;  %v1416_v41 = vrot.slane %v1409_v36, 4  ;;  %v1418_v42 = vsel %vm1118_vm1, %v1412_v38, %v1393_v28  ;;  %v1415_v52 = vsel %vm1118_vm1, 0.0, %v1414_v40 }
 0x359   : > { %v1422_v43 = vperm.slane %v1418_v42, %v4404_v19  ;;  %v1423_v44 = vrot.slane %v1413_v39, 4 }
 0x35a   : > { %v1417_v46 = vsel %vm1118_vm1, 0.0, %v1416_v41  ;;  %v1429_v47 = vsel %vm1118_vm1, %v1416_v41, %v1405_v34 }
 0x35b   : > { %v1424_v48 = vsel %vm1118_vm1, %v1423_v44, %v1411_v45  ;;  %v1433_v49 = vperm.slane %v1429_v47, %v4404_v19  ;;  %v1434_v50 = vrot.slane %v1417_v46, 4  ;;  %v1442_v51 = vrot.slane %v1422_v43, 4 }
 0x35c   : > { %v1428_v53 = vperm.slane %v1424_v48, %v4404_v19 }
 0x35d   : > { %v1435_v54 = vsel %vm1118_vm1, %v1434_v50, %v1415_v52  ;;  %v1454_v55 = vrot.slane %v1433_v49, 4 }
 0x35e   : > { %v1439_v56 = vperm.slane %v1435_v54, %v4404_v19  ;;  %v1443_v57 = vsel %vm1118_vm1, %v1428_v53, %v1442_v51  ;;  %v1440_v7 = vrot.slane %v1428_v53, 4 }
 0x35f   : > { %v1451_v10 = vperm.slane %v1443_v57, %v4410_v29 }
 0x360   : > { %v1455_v11 = vsel %vm1118_vm1, %v1439_v56, %v1454_v55  ;;  %v1441_v59 = vsel %vm1118_vm1, %v1440_v7, %v1422_v43  ;;  %v1452_v61 = vrot.slane %v1439_v56, 4 }
 0x361   : > { %v1463_v62 = vperm.slane %v1455_v11, %v4410_v29  ;;  %v1470_v63 = vrot.slane %v1451_v10, 4  ;;  %v1447_v0 = vperm.slane %v1441_v59, %v4410_v29 }
 0x362   : > { %v1453_v1 = vsel %vm1118_vm1, %v1452_v61, %v1433_v49 }
 0x363   : > { %v1471_v2 = vsel %vm1118_vm1, %v1463_v62, %v1470_v63  ;;  %v1459_v3 = vperm.slane %v1453_v1, %v4410_v29  ;;  %v1466_v6 = vrot.slane %v1447_v0, 4  ;;  %v1468_v8 = vrot.slane %v1463_v62, 4 }
 0x364   : > { %1708 = vmatpush.msra.mxu1 %v1471_v2 }
 0x365   : > { %v1467_v9 = vsel %vm1118_vm1, %v1459_v3, %v1466_v6  ;;  %v1469_v13 = vsel %vm1118_vm1, %v1468_v8, %v1451_v10  ;;  %v1464_v14 = vrot.slane %v1459_v3, 4 }
 0x366   : > { %1662 = vmatpush.msra.mxu3 %v1467_v9  ;;  %1685 = vmatpush.msra.mxu0 %v1469_v13 }
 0x367   : > { %v1465_v15 = vsel %vm1118_vm1, %v1464_v14, %v1447_v0 }
 0x368   : > { %1639 = vmatpush.msrb.mxu2 %v1465_v15 }
 0x3b3   : > { %v1609_v17 = vpop.xlane.xlu2 %1608 }
 0x3b4   : > { %3521 = vrcp.f32 %v1609_v17 }
 0x3b5   : > { %v1603_v18 = vpop.xlane.xlu1 %1602 }
 0x3b6   : > { %3523 = vrcp.f32 %v1603_v18 }
 0x3b9   : > { %v1606_v20 = vpop.xlane.xlu0 %1605 }
 0x3ba   : > { %v3522_v22 = vpop.eup %3521  ;;  %3525 = vrcp.f32 %v1606_v20 }
 0x3bb   : > { %v1619_v23 = vmul.f32 %v3522_v22, %v4506_v58 }
 0x3bc   : > { %v3524_v24 = vpop.eup %3523 }
 0x3bd   : > { %3332 = vmatmul.msk.f32.vlgmr.msra.gmra.mxu0 %vm1472_vm2, %v1619_v23  ;;  %v1617_v25 = vmul.f32 %v3524_v24, %v4510_v12 }
 0x3bf   : > { %3330 = vmatmul.msk.f32.vlgmr.msrb.gmra.mxu2 %vm1472_vm2, %v1617_v25 }
 0x3c0   : > { %v3526_v26 = vpop.eup %3525 }
 0x3c1   : > { %v1612_v16 = vpop.xlane.xlu1 %1611  ;;  %v1618_v21 = vmul.f32 %v3526_v26, %v4514_v60 }
 0x3c2   : > { %3527 = vrcp.f32 %v1612_v16 }
 0x3c3   : > { %3331 = vmatmul.msk.f32.vlgmr.msra.gmra.mxu3 %vm1472_vm2, %v1618_v21 }
 0x3c8   : > { %v3528_v27 = vpop.eup %3527 }
 0x3c9   : > { %v1620_v28 = vmul.f32 %v3528_v27, %v4518_v5 }
 0x3cb   : > { %3333 = vmatmul.msk.f32.vlgmr.msra.gmra.mxu1 %vm1472_vm2, %v1620_v28 }
 0x43a   : > { %v1687_v58 = vpop.f32.mrf.mxu0 }
 0x43b   : > { %v1713_v31 = vrot.slane %v1687_v58, 4 }
 0x442   : > { %v1641_v30 = vpop.f32.mrf.mxu2 }
 0x443   : > { %v1715_v32 = vrot.slane %v1641_v30, 4  ;;  %v1714_v12 = vsel %vm1118_vm1, %v1713_v31, %v1641_v30 }
 0x444   : > { %v1720_v36 = vperm.slane %v1714_v12, %v4404_v19 }
 0x445   : > { %v1716_v33 = vsel %vm1118_vm1, %v1687_v58, %v1715_v32 }
 0x446   : > { %v1724_v34 = vperm.slane %v1716_v33, %v4404_v19  ;;  %v1664_v35 = vpop.f32.mrf.mxu3  ;;  %v1739_v42 = vrot.slane %v1720_v36, 4  ;;  %v1843_v33 = vld [vmem:[%s5231_s29 + $0x18] sm:$0xff] }
 0x447   : > { %v1727_v60 = vrot.slane %v1664_v35, 4  ;;  %1863 = vmatpush.msra.mxu2 %v1843_v33 }
 0x448   : > { %v1710_v37 = vpop.f32.mrf.mxu1  ;;  %v1751_v39 = vrot.slane %v1724_v34, 4 }
 0x449   : > { %v1725_v38 = vrot.slane %v1710_v37, 4  ;;  %v1728_v5 = vsel %vm1118_vm1, %v1710_v37, %v1727_v60  ;;  %v1840_v60 = vld [vmem:[%s5231_s29] sm:$0xff] }
 0x44a   : > { %v1736_v40 = vperm.slane %v1728_v5, %v4404_v19 }
 0x44b   : > { %v1726_v41 = vsel %vm1118_vm1, %v1725_v38, %v1664_v35  ;;  %v1841_v35 = vld [vmem:[%s5231_s29 + $0x8] sm:$0xff] }
 0x44c   : > { %v1732_v43 = vperm.slane %v1726_v41, %v4404_v19  ;;  %v1749_v44 = vrot.slane %v1736_v40, 4  ;;  %v1752_v45 = vsel %vm1118_vm1, %v1736_v40, %v1751_v39  ;;  %v1946_v41 = vld [vmem:[#allocation10 + $0x18] sm:$0xff] }
 0x44d   : > { %v1760_v46 = vperm.slane %v1752_v45, %v4410_v29  ;;  %1966 = vmatpush.msrb.mxu0 %v1946_v41  ;;  %v1062_v45 = vld [vmem:[%s917_s8] sm:$0xff] }
 0x44e   : > { %v1737_v47 = vrot.slane %v1732_v43, 4  ;;  %v1740_v48 = vsel %vm1118_vm1, %v1732_v43, %v1739_v42  ;;  %v1750_v49 = vsel %vm1118_vm1, %v1749_v44, %v1724_v34  ;;  %v1842_v34 = vld [vmem:[%s5231_s29 + $0x10] sm:$0xff]  ;;  %v1944_v43 = vld [vmem:[#allocation10 + $0x8] sm:$0xff]  ;;  %v1943_v44 = vld [vmem:[#allocation10] sm:$0xff] }
 0x44f   : > { %v1748_v50 = vperm.slane %v1740_v48, %v4410_v29  ;;  %v1756_v51 = vperm.slane %v1750_v49, %v4410_v29  ;;  %v1767_v52 = vrot.slane %v1760_v46, 4  ;;  %1864 = vmatpush.msra.mxu2 %v1842_v34  ;;  %v1945_v42 = vld [vmem:[#allocation10 + $0x10] sm:$0xff] }
 0x450   : > { %v1738_v53 = vsel %vm1118_vm1, %v1737_v47, %v1720_v36  ;;  %1967 = vmatpush.msrb.mxu0 %v1945_v42 }
 0x451   : > { %v1744_v54 = vperm.slane %v1738_v53, %v4410_v29  ;;  %v1763_v55 = vrot.slane %v1748_v50, 4  ;;  %v1765_v56 = vrot.slane %v1756_v51, 4  ;;  %v1768_v57 = vsel %vm1118_vm1, 0.0, %v1767_v52  ;;  %1865 = vmatpush.msra.mxu2 %v1841_v35 }
 0x452   : > { %v1780_v7 = vsel %vm1118_vm1, %v1767_v52, %v1756_v51  ;;  %v1785_v10 = vrot.slane %v1768_v57, 4  ;;  %1968 = vmatpush.msrb.mxu0 %v1944_v43  ;;  %v3984_v51 = vmov 32.0  }
 0x453   : > { %v1761_v11 = vrot.slane %v1744_v54, 4  ;;  %v1764_v59 = vsel %vm1118_vm1, 0.0, %v1763_v55  ;;  %v1766_v61 = vsel %vm1118_vm1, 0.0, %v1765_v56  ;;  %v1784_v62 = vperm.slane %v1780_v7, %v4404_v19  ;;  %1866 = vmatpush.msra.mxu2 %v1840_v60 }
 0x454   : > { %v1774_v63 = vrot.slane %v1764_v59, 4  ;;  %v1769_v0 = vsel %vm1118_vm1, %v1763_v55, %v1744_v54  ;;  %v1786_v1 = vsel %vm1118_vm1, %v1785_v10, %v1766_v61  ;;  %1969 = vmatpush.msrb.mxu0 %v1943_v44  ;;  %3529 = vrcp.f32 %v3984_v51  ;;  %v3502_v54 = vld [vmem:[%s5233_s13] ss:$0 sm:$0xff] }
 0x455   : > { %v1762_v2 = vsel %vm1118_vm1, 0.0, %v1761_v11  ;;  %v1773_v3 = vperm.slane %v1769_v0, %v4404_v19  ;;  %v1790_v6 = vperm.slane %v1786_v1, %v4404_v19  ;;  %v1805_v8 = vrot.slane %v1784_v62, 4  ;;  %3336 = vmatmul.msk.f32.vlgmr.msrb.gmra.mxu0 %vm1073_vm0, %v1062_v45  ;;  %v1914_v0 = vld [vmem:[%s5234_s14 + $0x18] sm:$0xff]  ;;  %v1913_v1 = vld [vmem:[%s5234_s14 + $0x10] sm:$0xff]  ;;  %v3503_v44 = vld [vmem:[%s5235_s24] ss:$0 sm:$0xff] }
 0x456   : > { %v1775_v9 = vsel %vm1118_vm1, %v1774_v63, %v1762_v2  ;;  %1934 = vmatpush.msrb.mxu3 %v1914_v0  ;;  %v1912_v2 = vld [vmem:[%s5234_s14 + $0x8] sm:$0xff]  ;;  %s5171_s24 = scalar_lea.sflag [#allocation16], %s4332_s12 }
 0x457   : > { %v1779_v13 = vperm.slane %v1775_v9, %v4404_v19  ;;  %v1793_v14 = vrot.slane %v1773_v3, 4  ;;  %v1806_v15 = vsel %vm1118_vm1, %v1790_v6, %v1805_v8  ;;  %v1803_v17 = vrot.slane %v1790_v6, 4 }
 0x458   : > { %v1814_v18 = vperm.slane %v1806_v15, %v4410_v29  ;;  %1935 = vmatpush.msrb.mxu3 %v1913_v1 }
 0x459   : > { %v1794_v20 = vsel %vm1118_vm1, %v1779_v13, %v1793_v14  ;;  %v1791_v22 = vrot.slane %v1779_v13, 4  ;;  %v1804_v23 = vsel %vm1118_vm1, %v1803_v17, %v1784_v62 }
 0x45a   : > { %v1802_v24 = vperm.slane %v1794_v20, %v4410_v29  ;;  %v1819_v25 = vrot.slane %v1814_v18, 4  ;;  %v1810_v26 = vperm.slane %v1804_v23, %v4410_v29  ;;  %v3530_v52 = vpop.eup %3529  ;;  %1936 = vmatpush.msrb.mxu3 %v1912_v2 }
 0x45b   : > { %v1792_v16 = vsel %vm1118_vm1, %v1791_v22, %v1773_v3  ;;  %v1878_v53 = vmul.f32 32.0, %v3530_v52  ;;  %vm1882_vm5 = vweird.f32 %v3530_v52  ;;  %v1911_v3 = vld [vmem:[%s5234_s14] sm:$0xff] }
 0x45c   : > { %v1820_v21 = vsel %vm1118_vm1, %v1819_v25, %v1802_v24  ;;  %v1821_v27 = vrot.slane %v1802_v24, 4  ;;  %v1798_v28 = vperm.slane %v1792_v16, %v4410_v29  ;;  %v1815_v58 = vrot.slane %v1810_v26, 4  ;;  %1937 = vmatpush.msrb.mxu3 %v1911_v3 }
 0x45d   : > { %1828 = vrot.lane.b32.xlu2 %v1820_v21, %s5165_s10  ;;  %s5232_s10 = sld [smem:[#allocation42_spill]]  ;;  %v1879_v55 = vsub.f32 1.0, %v1878_v53 }
 0x45e   : > { %v1822_v30 = vsel %vm1118_vm1, %v1814_v18, %v1821_v27  ;;  %v1817_v31 = vrot.slane %v1798_v28, 4  ;;  %v1816_v32 = vsel %vm1118_vm1, %v1815_v58, %v1798_v28 }
 0x45f   : > { %1832 = vrot.lane.b32.xlu1 %v1822_v30, %s5164_s4  ;;  %v1880_v7 = vmul.f32 %v3530_v52, %v1879_v55  ;;  %s5236_s4 = sld [smem:[#allocation44_spill]] }
 0x460   : > { %v1818_v12 = vsel %vm1118_vm1, %v1810_v26, %v1817_v31 }
 0x461   : > { %1824 = vrot.lane.b32.xlu0 %v1818_v12, %s3983_s0 }
 0x463   : > { %v3501_v46 = vld [vmem:[%s5232_s10] ss:$0 sm:$0xff] }
 0x465   : > { %v3504_v51 = vld [vmem:[%s5236_s4] ss:$0 sm:$0xff]  ;;  %s4980_s4 = sshll.u32 %s4151_s3, 3 }
 0x4b7   : > { %v1829_v37 = vpop.permute.xlu2 %1828 }
 0x4d1   : > { %v1833_v5 = vpop.permute.xlu1 %1832 }
 0x4d2   : > { %v1971_v56 = vpop.f32.mrf.mxu0 }
 0x4d3   : > { %v1825_v36 = vpop.permute.xlu0 %1824  ;;  %v4644_v57 = vadd.f32 %v3502_v54, %v1971_v56 }
 0x4d4   : > { %v1835_v38 = vsel %vm1472_vm2, %v1816_v32, %v1825_v36 }
 0x4d5   : > { %v1837_v39 = vsel %vm1836_vm3, %v1835_v38, %v1829_v37  ;;  %2100 = vrot.lane.b32.xlu1 %v4644_v57, %s3975_s20  ;;  %v2111_v13 = vrot.slane %v4644_v57, 4  ;;  %1974 = vst.msk [vmem:[%s5167_s6] sm:$0xff] %vm1073_vm0, %v4644_v57 }
 0x4d6   : > { %v1839_v40 = vsel %vm1838_vm4, %v1837_v39, %v1833_v5 }
 0x4d7   : > { %3334 = vmatmul.msk.f32.vlgmr.msra.gmra.mxu2 %vm1073_vm0, %v1839_v40 }
 0x4dd   : > { %2103 = vrot.lane.b32.xlu1 %v4644_v57, %s3976_s18 }
 0x4e5   : > { %2106 = vrot.lane.b32.xlu1 %v4644_v57, %s3977_s25 }
 0x547   : > { %v4668_v6 = vpop.permute.xlu1 %2100 }
 0x548   : > { %v2123_v24 = vrot.slane %v4668_v6, 4 }
 0x54f   : > { %v4672_v15 = vpop.permute.xlu1 %2103 }
 0x550   : > { %v2109_v17 = vrot.slane %v4672_v15, 4  ;;  %v2112_v18 = vsel %vm1118_vm1, %v4672_v15, %v2111_v13  ;;  %v3495_v20 = vpack.i.bf16 %v4672_v15, %v4668_v6 }
 0x551   : > { %v2120_v23 = vperm.slane %v2112_v18, %v4404_v19 }
 0x552   : > { %v2110_v22 = vsel %vm1118_vm1, %v2109_v17, %v4644_v57 }
 0x553   : > { %v2116_v26 = vperm.slane %v2110_v22, %v4404_v19  ;;  %v2147_v21 = vrot.slane %v2120_v23, 4 }
 0x555   : > { %v2135_v31 = vrot.slane %v2116_v26, 4 }
 0x557   : > { %v4684_v27 = vpop.permute.xlu1 %2106 }
 0x558   : > { %v2121_v58 = vrot.slane %v4684_v27, 4  ;;  %v2124_v30 = vsel %vm1118_vm1, %v4684_v27, %v2123_v24 }
 0x559   : > { %v2132_v32 = vperm.slane %v2124_v30, %v4404_v19 }
 0x55a   : > { %v1868_v47 = vpop.f32.mrf.mxu2  ;;  %v2122_v33 = vsel %vm1118_vm1, %v2121_v58, %v4668_v6 }
 0x55b   : > { %v1869_v48 = vadd.f32 %v3501_v46, %v1868_v47  ;;  %v2128_v34 = vperm.slane %v2122_v33, %v4404_v19  ;;  %v2145_v35 = vrot.slane %v2132_v32, 4  ;;  %v2148_v60 = vsel %vm1118_vm1, %v2132_v32, %v2147_v21 }
 0x55c   : > { %v2156_v37 = vperm.slane %v2148_v60, %v4410_v29 }
 0x55d   : > { %v1871_v49 = vadd.f32 %v1869_v48, %v4367_v4  ;;  %v1881_v4 = vadd.f32 %v3530_v52, %v1880_v7  ;;  %v2133_v38 = vrot.slane %v2128_v34, 4  ;;  %v2136_v5 = vsel %vm1118_vm1, %v2128_v34, %v2135_v31 }
 0x55e   : > { %v2146_v39 = vsel %vm1118_vm1, %v2145_v35, %v2120_v23  ;;  %v2144_v41 = vperm.slane %v2136_v5, %v4410_v29  ;;  %v2163_v43 = vrot.slane %v2156_v37, 4  ;;  %v3505_v35 = vld [vmem:[%s5237_s1] ss:$0 sm:$0xff]  ;;  %s5246_s1 = sld [smem:[#allocation59_spill]] }
 0x55f   : > { %v1874_v50 = vsel %vm1073_vm0, %v1871_v49, 0.0  ;;  %v4650_v10 = vsel %vm1882_vm5, %v3530_v52, %v1881_v4  ;;  %v2152_v42 = vperm.slane %v2146_v39, %v4410_v29  ;;  %v2134_v45 = vsel %vm1118_vm1, %v2133_v38, %v2116_v26 }
 0x560   : > { %1875 = vadd.xlane.f32.xlu0 %v1874_v50  ;;  %v2140_v47 = vperm.slane %v2134_v45, %v4410_v29  ;;  %v2159_v48 = vrot.slane %v2144_v41, 4  ;;  %v2164_v52 = vsel %vm1118_vm1, 0.0, %v2163_v43 }
 0x561   : > { %v2176_v53 = vsel %vm1118_vm1, %v2163_v43, %v2152_v42 }
 0x562   : > { %v2157_v54 = vrot.slane %v2140_v47, 4  ;;  %v2160_v55 = vsel %vm1118_vm1, 0.0, %v2159_v48  ;;  %v2180_v7 = vperm.slane %v2176_v53, %v4404_v19 }
 0x564   : > { %v2201_v0 = vrot.slane %v2180_v7, 4  ;;  %s3785_s2 = scalar_lea.hbm %s5246_s1, 16 }
 0x5d3   : > { %v1876_v11 = vpop.xlane.xlu0 %1875 }
 0x5d4   : > { %v1884_v59 = vmul.f32 %v4650_v10, %v1876_v11  ;;  %v2170_v11 = vrot.slane %v2160_v55, 4 }
 0x5d6   : > { %v1885_v61 = vsub.f32 %v1871_v49, %v1884_v59  ;;  %v2161_v49 = vrot.slane %v2152_v42, 4  ;;  %v2181_v59 = vrot.slane %v2164_v52, 4 }
 0x5d8   : > { %v1886_v62 = vmul.f32 %v1885_v61, %v1885_v61  ;;  %v2162_v56 = vsel %vm1118_vm1, 0.0, %v2161_v49 }
 0x5d9   : > { %v2182_v2 = vsel %vm1118_vm1, %v2181_v59, %v2162_v56 }
 0x5da   : > { %v1887_v63 = vsel %vm1073_vm0, %v1886_v62, 0.0  ;;  %v2158_v62 = vsel %vm1118_vm1, 0.0, %v2157_v54 }
 0x5db   : > { %1888 = vadd.xlane.f32.xlu2 %v1887_v63  ;;  %v2171_v3 = vsel %vm1118_vm1, %v2170_v11, %v2158_v62 }
 0x64e   : > { %v1889_v8 = vpop.xlane.xlu2 %1888 }
 0x64f   : > { %v1890_v9 = vmul.f32 %v1889_v8, %v4650_v10  ;;  %v2186_v8 = vperm.slane %v2182_v2, %v4404_v19 }
 0x651   : > { %v1891_v14 = vadd.f32 1e-05, %v1890_v9  ;;  %v2175_v9 = vperm.slane %v2171_v3, %v4404_v19  ;;  %v2199_v17 = vrot.slane %v2186_v8, 4  ;;  %v2202_v22 = vsel %vm1118_vm1, %v2186_v8, %v2201_v0 }
 0x652   : > { %v2210_v24 = vperm.slane %v2202_v22, %v4410_v29 }
 0x653   : > { %3531 = vrsqrt.f32 %v1891_v14  ;;  %vm1898_vm7 = vweird.f32 %v1891_v14  ;;  %v2200_v26 = vsel %vm1118_vm1, %v2199_v17, %v2180_v7 }
 0x654   : > { %v2206_v21 = vperm.slane %v2200_v26, %v4410_v29 }
 0x656   : > { %v2211_v30 = vrot.slane %v2206_v21, 4 }
 0x659   : > { %v3532_v25 = vpop.eup %3531 }
 0x65a   : > { %v1893_v16 = vmul.f32 %v3532_v25, %v1891_v14  ;;  %vm1899_vm6 = vweird.f32 %v3532_v25  ;;  %v2187_v14 = vrot.slane %v2175_v9, 4 }
 0x65b   : > { %vm1900_vm8 = vmor %vm1898_vm7, %vm1899_vm6 }
 0x65c   : > { %v1894_v28 = vmul.f32 %v3532_v25, %v1893_v16 }
 0x65e   : > { %v1895_v12 = vmul.f32 0.5, %v1894_v28  ;;  %v2215_v28 = vrot.slane %v2210_v24, 4 }
 0x660   : > { %v1896_v36 = vsub.f32 1.5, %v1895_v12 }
 0x662   : > { %v1897_v40 = vmul.f32 %v3532_v25, %v1896_v36 }
 0x664   : > { %v1901_v46 = vsel %vm1900_vm8, %v3532_v25, %v1897_v40 }
 0x665   : > { %v1902_v50 = vmul.f32 %v1901_v46, %v1885_v61  ;;  %v2165_v61 = vsel %vm1118_vm1, %v2159_v48, %v2140_v47 }
 0x666   : > { %v2169_v63 = vperm.slane %v2165_v61, %v4404_v19 }
 0x667   : > { %v1906_v4 = vmul.f32 %v3503_v44, %v1902_v50 }
 0x668   : > { %v2189_v13 = vrot.slane %v2169_v63, 4  ;;  %v2188_v25 = vsel %vm1118_vm1, %v2187_v14, %v2169_v63 }
 0x669   : > { %v4720_v1 = vadd.f32 %v3504_v51, %v1906_v4  ;;  %v2194_v16 = vperm.slane %v2188_v25, %v4410_v29 }
 0x66a   : > { %v2190_v18 = vsel %vm1118_vm1, %v2175_v9, %v2189_v13 }
 0x66b   : > { %3335 = vmatmul.msk.f32.vlgmr.msrb.gmra.mxu3 %vm1073_vm0, %v4720_v1  ;;  %v2198_v23 = vperm.slane %v2190_v18, %v4410_v29  ;;  %v2213_v31 = vrot.slane %v2194_v16, 4  ;;  %v2212_v33 = vsel %vm1118_vm1, %v2211_v30, %v2194_v16 }
 0x66c   : > { %3337 = vmatpush.xpose.msk.msrb.mxu1 %vm1472_vm2, %v2212_v33 }
 0x66d   : > { %v2217_v58 = vrot.slane %v2198_v23, 4  ;;  %v2216_v32 = vsel %vm1118_vm1, %v2215_v28, %v2198_v23  ;;  %v2214_v34 = vsel %vm1118_vm1, %v2206_v21, %v2213_v31 }
 0x66e   : > { %3341 = vmatpush.xpose.msk.msra.mxu3 %vm1472_vm2, %v2216_v32  ;;  %3339 = vmatpush.xpose.msk.msrb.mxu2 %vm1472_vm2, %v2214_v34 }
 0x66f   : > { %v2218_v12 = vsel %vm1118_vm1, %v2210_v24, %v2217_v58 }
 0x670   : > { %3343 = vmatpush.xpose.msk.msra.mxu0 %vm1472_vm2, %v2218_v12 }
 0x6ee   : > { %v1939_v60 = vpop.f32.mrf.mxu3 }
 0x6ef   : > { %v1940_v36 = vadd.f32 %v3505_v35, %v1939_v60 }
 0x6f1   : > { %v1942_v37 = vmul.f32 0.35355338, %v1940_v36 }
 0x6f3   : > { %1984 = vrot.lane.b32.xlu0 %v1942_v37, %s3976_s18  ;;  %1981 = vrot.lane.b32.xlu1 %v1942_v37, %s3975_s20  ;;  %v1992_v40 = vrot.slane %v1942_v37, 4  ;;  %s5239_s20 = smov 24   ;;  %s5247_s18 = scalar_lea.vmem [#allocation15], %s4323_s7 }
 0x6fb   : > { %1987 = vrot.lane.b32.xlu1 %v1942_v37, %s3977_s25  ;;  %s2959_s25 = sshll.u32 %s5247_s18, 4  ;;  %s2960_s25 = int_to_ptr.vmem [resolvable:$true] %s2959_s25 }
 0x765   : > { %v1985_v38 = vpop.permute.xlu0 %1984  ;;  %v1982_v5 = vpop.permute.xlu1 %1981 }
 0x766   : > { %v1990_v39 = vrot.slane %v1985_v38, 4  ;;  %v1993_v41 = vsel %vm1118_vm1, %v1985_v38, %v1992_v40  ;;  %v2004_v44 = vrot.slane %v1982_v5, 4 }
 0x767   : > { %v2001_v43 = vperm.slane %v1993_v41, %v4404_v19 }
 0x768   : > { %v1991_v42 = vsel %vm1118_vm1, %v1990_v39, %v1942_v37 }
 0x769   : > { %v1997_v45 = vperm.slane %v1991_v42, %v4404_v19  ;;  %v2028_v49 = vrot.slane %v2001_v43, 4 }
 0x76b   : > { %v2016_v52 = vrot.slane %v1997_v45, 4 }
 0x76d   : > { %v1988_v46 = vpop.permute.xlu1 %1987 }
 0x76e   : > { %v2002_v47 = vrot.slane %v1988_v46, 4  ;;  %v2005_v48 = vsel %vm1118_vm1, %v1988_v46, %v2004_v44 }
 0x76f   : > { %v2013_v50 = vperm.slane %v2005_v48, %v4404_v19 }
 0x770   : > { %v2003_v51 = vsel %vm1118_vm1, %v2002_v47, %v1982_v5  ;;  %v1064_v47 = vld [vmem:[%s937_s26] sm:$0xff]  ;;  %s5166_s26 = scalar_lea.vmem [#allocation20], %s4323_s7 }
 0x771   : > { %v2009_v53 = vperm.slane %v2003_v51, %v4404_v19  ;;  %v2026_v54 = vrot.slane %v2013_v50, 4  ;;  %v2029_v55 = vsel %vm1118_vm1, %v2013_v50, %v2028_v49 }
 0x772   : > { %v2037_v56 = vperm.slane %v2029_v55, %v4410_v29 }
 0x773   : > { %v2014_v7 = vrot.slane %v2009_v53, 4  ;;  %v2017_v4 = vsel %vm1118_vm1, %v2009_v53, %v2016_v52  ;;  %v2027_v11 = vsel %vm1118_vm1, %v2026_v54, %v2001_v43 }
 0x774   : > { %v2025_v59 = vperm.slane %v2017_v4, %v4410_v29  ;;  %v2033_v61 = vperm.slane %v2027_v11, %v4410_v29  ;;  %v2044_v62 = vrot.slane %v2037_v56, 4 }
 0x775   : > { %v2015_v63 = vsel %vm1118_vm1, %v2014_v7, %v1997_v45 }
 0x776   : > { %v2021_v0 = vperm.slane %v2015_v63, %v4410_v29  ;;  %v2040_v2 = vrot.slane %v2025_v59, 4  ;;  %v2042_v3 = vrot.slane %v2033_v61, 4  ;;  %v2045_v8 = vsel %vm1118_vm1, 0.0, %v2044_v62 }
 0x777   : > { %v2057_v9 = vsel %vm1118_vm1, %v2044_v62, %v2033_v61  ;;  %v2062_v13 = vrot.slane %v2045_v8, 4 }
 0x778   : > { %v2038_v14 = vrot.slane %v2021_v0, 4  ;;  %v2041_v17 = vsel %vm1118_vm1, 0.0, %v2040_v2  ;;  %v2043_v18 = vsel %vm1118_vm1, 0.0, %v2042_v3  ;;  %v2046_v22 = vsel %vm1118_vm1, %v2040_v2, %v2021_v0 }
 0x779   : > { %v2051_v23 = vrot.slane %v2041_v17, 4  ;;  %v2061_v24 = vperm.slane %v2057_v9, %v4404_v19  ;;  %v2063_v25 = vsel %vm1118_vm1, %v2062_v13, %v2043_v18  ;;  %v2050_v26 = vperm.slane %v2046_v22, %v4404_v19 }
 0x77a   : > { %v2039_v16 = vsel %vm1118_vm1, 0.0, %v2038_v14  ;;  %v2067_v21 = vperm.slane %v2063_v25, %v4404_v19 }
 0x77b   : > { %v2082_v28 = vrot.slane %v2061_v24, 4  ;;  %v2052_v58 = vsel %vm1118_vm1, %v2051_v23, %v2039_v16  ;;  %v2070_v30 = vrot.slane %v2050_v26, 4 }
 0x77c   : > { %v2056_v31 = vperm.slane %v2052_v58, %v4404_v19  ;;  %v2080_v32 = vrot.slane %v2067_v21, 4 }
 0x77d   : > { %v2083_v12 = vsel %vm1118_vm1, %v2067_v21, %v2082_v28 }
 0x77e   : > { %v2071_v33 = vsel %vm1118_vm1, %v2056_v31, %v2070_v30  ;;  %v2091_v34 = vperm.slane %v2083_v12, %v4410_v29  ;;  %v2068_v35 = vrot.slane %v2056_v31, 4  ;;  %v2081_v60 = vsel %vm1118_vm1, %v2080_v32, %v2061_v24 }
 0x77f   : > { %v2079_v36 = vperm.slane %v2071_v33, %v4410_v29  ;;  %v2087_v37 = vperm.slane %v2081_v60, %v4410_v29 }
 0x780   : > { %v2096_v38 = vrot.slane %v2091_v34, 4  ;;  %v2069_v5 = vsel %vm1118_vm1, %v2068_v35, %v2050_v26 }
 0x781   : > { %v2075_v39 = vperm.slane %v2069_v5, %v4410_v29  ;;  %v2092_v40 = vrot.slane %v2087_v37, 4  ;;  %v2098_v41 = vrot.slane %v2079_v36, 4 }
 0x782   : > { %v2097_v42 = vsel %vm1118_vm1, %v2096_v38, %v2079_v36 }
 0x783   : > { %3342 = vmatmul.msk.f32.vlgmr.msra.gmra.mxu3 %vm1472_vm2, %v2097_v42  ;;  %v2093_v43 = vsel %vm1118_vm1, %v2092_v40, %v2075_v39  ;;  %v2099_v44 = vsel %vm1118_vm1, %v2091_v34, %v2098_v41  ;;  %v2094_v45 = vrot.slane %v2075_v39, 4 }
 0x784   : > { %3338 = vmatmul.msk.f32.vlgmr.msrb.gmra.mxu1 %vm1472_vm2, %v2093_v43  ;;  %3344 = vmatmul.msk.f32.vlgmr.msra.gmra.mxu0 %vm1472_vm2, %v2099_v44 }
 0x785   : > { %v2095_v46 = vsel %vm1118_vm1, %v2087_v37, %v2094_v45 }
 0x786   : > { %3340 = vmatmul.msk.f32.vlgmr.msrb.gmra.mxu2 %vm1472_vm2, %v2095_v46 }
 0x801   : > { %v2361_v48 = vpop.f32.mrf.mxu1  ;;  %v2439_v49 = vpop.f32.mrf.mxu0 }
 0x802   : > { %v2362_v50 = vadd.f32 %v2361_v48, %v1064_v47  ;;  %v2440_v51 = vadd.f32 %v2439_v49, %v1064_v47 }
 0x804   : > { %v2451_v52 = vsel %vm1472_vm2, %v2440_v51, -inf  ;;  %v2442_v53 = vsel %vm1472_vm2, %v2362_v50, -inf }
 0x805   : > { %2452 = vmax.xlane.f32.xlu0 %v2451_v52  ;;  %2443 = vmax.xlane.f32.xlu2 %v2442_v53 }
 0x806   : > { %v2413_v7 = vpop.f32.mrf.mxu3 }
 0x807   : > { %v2414_v4 = vadd.f32 %v2413_v7, %v1064_v47 }
 0x809   : > { %v2387_v54 = vpop.f32.mrf.mxu2  ;;  %v2448_v11 = vsel %vm1472_vm2, %v2414_v4, -inf }
 0x80a   : > { %v2388_v55 = vadd.f32 %v2387_v54, %v1064_v47 }
 0x80c   : > { %v2445_v56 = vsel %vm1472_vm2, %v2388_v55, -inf }
 0x80d   : > { %2446 = vmax.xlane.f32.xlu1 %v2445_v56 }
 0x81d   : > { %1976 = vrot.lane.b32.xlu2 %v4644_v57, %s3974_s11 }
 0x826   : > { %2223 = vrot.lane.b32.xlu1 %v4684_v27, %s3974_s11 }
 0x846   : > { %2449 = vmax.xlane.f32.xlu2 %v2448_v11 }
 0x85e   : > { %3496 = vrot.lane.b32.xlu2 %v3495_v20, %s3974_s11  ;;  %s5238_s11 = smov 16  }
 0x878   : > { %v2453_v59 = vpop.xlane.xlu0 %2452  ;;  %v2444_v61 = vpop.xlane.xlu2 %2443 }
 0x879   : > { %v2457_v62 = vsub.f32 %v2440_v51, %v2453_v59  ;;  %v2454_v3 = vsub.f32 %v2362_v50, %v2444_v61 }
 0x87b   : > { %v2464_v63 = vmul.f32 1.442695, %v2457_v62  ;;  %v2458_v15 = vmul.f32 1.442695, %v2454_v3 }
 0x87d   : > { %3533 = vpow2.f32 %v2464_v63 }
 0x880   : > { %v2447_v57 = vpop.xlane.xlu1 %2446  ;;  %v1977_v0 = vpop.permute.xlu2 %1976 }
 0x881   : > { %v2455_v2 = vsub.f32 %v2388_v55, %v2447_v57  ;;  %1979 = vst.msk [vmem:[%s5166_s26] sm:$0xff] %vm1073_vm0, %v1977_v0  ;;  %v2230_v25 = vrot.slane %v1977_v0, 4 }
 0x883   : > { %v4812_v27 = vpop.eup %3533  ;;  %v2460_v8 = vmul.f32 1.442695, %v2455_v2 }
 0x884   : > { %v2475_v6 = vsel %vm1472_vm2, %v4812_v27, 0.0 }
 0x885   : > { %3535 = vpow2.f32 %v2460_v8  ;;  %2476 = vadd.xlane.f32.xlu1 %v2475_v6 }
 0x886   : > { %3537 = vpow2.f32 %v2458_v15 }
 0x88b   : > { %v4816_v20 = vpop.eup %3535 }
 0x88c   : > { %v2469_v9 = vsel %vm1472_vm2, %v4816_v20, 0.0  ;;  %v4820_v13 = vpop.eup %3537 }
 0x88d   : > { %2470 = vadd.xlane.f32.xlu0 %v2469_v9  ;;  %v2466_v14 = vsel %vm1472_vm2, %v4820_v13, 0.0 }
 0x895   : > { %2467 = vadd.xlane.f32.xlu0 %v2466_v14 }
 0x898   : > { %v2224_v23 = vpop.permute.xlu1 %2223 }
 0x899   : > { %v2240_v26 = vrot.slane %v2224_v23, 4 }
 0x8b9   : > { %v2450_v17 = vpop.xlane.xlu2 %2449 }
 0x8ba   : > { %v2456_v18 = vsub.f32 %v2414_v4, %v2450_v17 }
 0x8bc   : > { %v2462_v22 = vmul.f32 1.442695, %v2456_v18 }
 0x8be   : > { %3539 = vpow2.f32 %v2462_v22 }
 0x8c1   : > { %v3497_v24 = vpop.permute.xlu2 %3496 }
 0x8c2   : > { %v3499_v16 = vunpack.i.h.bf16 %v3497_v24  ;;  %v3498_v21 = vunpack.i.l.bf16 %v3497_v24 }
 0x8c4   : > { %v4824_v28 = vpop.eup %3539  ;;  %v2228_v58 = vrot.slane %v3499_v16, 4  ;;  %v2231_v30 = vsel %vm1118_vm1, %v3499_v16, %v2230_v25  ;;  %v2241_v31 = vsel %vm1118_vm1, %v2240_v26, %v3498_v21  ;;  %v2242_v32 = vrot.slane %v3498_v21, 4 }
 0x8c5   : > { %v2239_v12 = vperm.slane %v2231_v30, %v4404_v19  ;;  %v2247_v33 = vperm.slane %v2241_v31, %v4404_v19  ;;  %v2472_v34 = vsel %vm1472_vm2, %v4824_v28, 0.0 }
 0x8c6   : > { %v2229_v35 = vsel %vm1118_vm1, %v2228_v58, %v1977_v0  ;;  %v2243_v60 = vsel %vm1118_vm1, %v2224_v23, %v2242_v32  ;;  %2473 = vadd.xlane.f32.xlu2 %v2472_v34 }
 0x8c7   : > { %v2235_v36 = vperm.slane %v2229_v35, %v4404_v19  ;;  %v2266_v37 = vrot.slane %v2239_v12, 4  ;;  %v2251_v38 = vperm.slane %v2243_v60, %v4404_v19  ;;  %v2252_v5 = vrot.slane %v2247_v33, 4 }
 0x8c9   : > { %v2254_v39 = vrot.slane %v2235_v36, 4  ;;  %v2253_v40 = vsel %vm1118_vm1, %v2252_v5, %v2235_v36  ;;  %v2264_v41 = vrot.slane %v2251_v38, 4  ;;  %v2267_v42 = vsel %vm1118_vm1, %v2251_v38, %v2266_v37 }
 0x8ca   : > { %v2259_v43 = vperm.slane %v2253_v40, %v4410_v29  ;;  %v2275_v44 = vperm.slane %v2267_v42, %v4410_v29 }
 0x8cb   : > { %v2255_v45 = vsel %vm1118_vm1, %v2247_v33, %v2254_v39  ;;  %v2265_v46 = vsel %vm1118_vm1, %v2264_v41, %v2239_v12 }
 0x8cc   : > { %v2263_v47 = vperm.slane %v2255_v45, %v4410_v29  ;;  %v2271_v48 = vperm.slane %v2265_v46, %v4410_v29  ;;  %v2282_v49 = vrot.slane %v2275_v44, 4  ;;  %v2276_v50 = vrot.slane %v2259_v43, 4 }
 0x8ce   : > { %v2278_v51 = vrot.slane %v2263_v47, 4  ;;  %v2280_v52 = vrot.slane %v2271_v48, 4  ;;  %v2283_v53 = vsel %vm1118_vm1, 0.0, %v2282_v49  ;;  %v2295_v54 = vsel %vm1118_vm1, %v2282_v49, %v2271_v48 }
 0x8cf   : > { %v2300_v55 = vrot.slane %v2283_v53, 4  ;;  %v2299_v56 = vperm.slane %v2295_v54, %v4404_v19  ;;  %v2277_v57 = vsel %vm1118_vm1, 0.0, %v2276_v50 }
 0x8d0   : > { %v2279_v7 = vsel %vm1118_vm1, 0.0, %v2278_v51  ;;  %v2281_v4 = vsel %vm1118_vm1, 0.0, %v2280_v52  ;;  %v2284_v11 = vsel %vm1118_vm1, %v2278_v51, %v2259_v43 }
 0x8d1   : > { %v2289_v59 = vrot.slane %v2279_v7, 4  ;;  %v2288_v61 = vperm.slane %v2284_v11, %v4404_v19  ;;  %v2301_v62 = vsel %vm1118_vm1, %v2300_v55, %v2281_v4  ;;  %v2320_v63 = vrot.slane %v2299_v56, 4 }
 0x8d2   : > { %v2305_v0 = vperm.slane %v2301_v62, %v4404_v19 }
 0x8d3   : > { %v2290_v2 = vsel %vm1118_vm1, %v2289_v59, %v2277_v57  ;;  %v2308_v3 = vrot.slane %v2288_v61, 4 }
 0x8d4   : > { %v2294_v8 = vperm.slane %v2290_v2, %v4404_v19  ;;  %v2321_v6 = vsel %vm1118_vm1, %v2305_v0, %v2320_v63  ;;  %v2318_v15 = vrot.slane %v2305_v0, 4 }
 0x8d5   : > { %v2329_v9 = vperm.slane %v2321_v6, %v4410_v29 }
 0x8d6   : > { %v2309_v14 = vsel %vm1118_vm1, %v2294_v8, %v2308_v3  ;;  %v2306_v17 = vrot.slane %v2294_v8, 4  ;;  %v2319_v18 = vsel %vm1118_vm1, %v2318_v15, %v2299_v56 }
 0x8d7   : > { %v2317_v22 = vperm.slane %v2309_v14, %v4410_v29  ;;  %v2334_v23 = vrot.slane %v2329_v9, 4  ;;  %v2325_v24 = vperm.slane %v2319_v18, %v4410_v29 }
 0x8d8   : > { %v2307_v25 = vsel %vm1118_vm1, %v2306_v17, %v2288_v61 }
 0x8d9   : > { %v2335_v26 = vsel %vm1118_vm1, %v2334_v23, %v2317_v22  ;;  %v2313_v16 = vperm.slane %v2307_v25, %v4410_v29  ;;  %v2330_v21 = vrot.slane %v2325_v24, 4  ;;  %v2336_v58 = vrot.slane %v2317_v22, 4 }
 0x8da   : > { %2550 = vmatpush.msrb.mxu3 %v2335_v26 }
 0x8db   : > { %v2331_v30 = vsel %vm1118_vm1, %v2330_v21, %v2313_v16  ;;  %v2337_v31 = vsel %vm1118_vm1, %v2329_v9, %v2336_v58  ;;  %v2332_v32 = vrot.slane %v2313_v16, 4 }
 0x8dc   : > { %2504 = vmatpush.msra.mxu1 %v2331_v30  ;;  %2573 = vmatpush.msrb.mxu0 %v2337_v31 }
 0x8dd   : > { %v2333_v12 = vsel %vm1118_vm1, %v2325_v24, %v2332_v32 }
 0x8de   : > { %2527 = vmatpush.msra.mxu2 %v2333_v12 }
 0x8f8   : > { %v2477_v33 = vpop.xlane.xlu1 %2476 }
 0x8f9   : > { %3541 = vrcp.f32 %v2477_v33 }
 0x8ff   : > { %v3542_v34 = vpop.eup %3541 }
 0x900   : > { %v2485_v35 = vmul.f32 %v3542_v34, %v4812_v27  ;;  %v2471_v60 = vpop.xlane.xlu0 %2470 }
 0x901   : > { %3543 = vrcp.f32 %v2471_v60 }
 0x902   : > { %3348 = vmatmul.msk.f32.vlgmr.msrb.gmra.mxu0 %vm1472_vm2, %v2485_v35 }
 0x907   : > { %v3544_v36 = vpop.eup %3543 }
 0x908   : > { %v2483_v37 = vmul.f32 %v3544_v36, %v4816_v20  ;;  %v2468_v38 = vpop.xlane.xlu0 %2467 }
 0x909   : > { %3545 = vrcp.f32 %v2468_v38 }
 0x90a   : > { %3346 = vmatmul.msk.f32.vlgmr.msra.gmra.mxu2 %vm1472_vm2, %v2483_v37 }
 0x90f   : > { %v3546_v5 = vpop.eup %3545 }
 0x910   : > { %v2482_v39 = vmul.f32 %v3546_v5, %v4820_v13 }
 0x912   : > { %3345 = vmatmul.msk.f32.vlgmr.msra.gmra.mxu1 %vm1472_vm2, %v2482_v39 }
 0x939   : > { %v2474_v40 = vpop.xlane.xlu2 %2473 }
 0x93a   : > { %3547 = vrcp.f32 %v2474_v40 }
 0x940   : > { %v3548_v41 = vpop.eup %3547 }
 0x941   : > { %v2484_v27 = vmul.f32 %v3548_v41, %v4824_v28 }
 0x943   : > { %3347 = vmatmul.msk.f32.vlgmr.msrb.gmra.mxu3 %vm1472_vm2, %v2484_v27 }
 0x97f   : > { %v2575_v44 = vpop.f32.mrf.mxu0 }
 0x980   : > { %v2590_v20 = vrot.slane %v2575_v44, 4 }
 0x98d   : > { %v2529_v42 = vpop.f32.mrf.mxu2 }
 0x98e   : > { %v2592_v43 = vrot.slane %v2529_v42, 4  ;;  %v2591_v47 = vsel %vm1118_vm1, %v2590_v20, %v2529_v42 }
 0x98f   : > { %v2506_v46 = vpop.f32.mrf.mxu1  ;;  %v2597_v49 = vperm.slane %v2591_v47, %v4404_v19  ;;  %v2705_v47 = vld [vmem:[#allocation11 + $0x10] sm:$0xff] }
 0x990   : > { %v2593_v45 = vsel %vm1118_vm1, %v2575_v44, %v2592_v43  ;;  %v2580_v48 = vrot.slane %v2506_v46, 4 }
 0x991   : > { %v2601_v13 = vperm.slane %v2593_v45, %v4404_v19  ;;  %v2602_v55 = vrot.slane %v2597_v49, 4 }
 0x993   : > { %v2614_v52 = vrot.slane %v2601_v13, 4 }
 0x9c6   : > { %v2552_v50 = vpop.f32.mrf.mxu3 }
 0x9c7   : > { %v2578_v51 = vrot.slane %v2552_v50, 4  ;;  %v2581_v28 = vsel %vm1118_vm1, %v2552_v50, %v2580_v48 }
 0x9c8   : > { %v2589_v53 = vperm.slane %v2581_v28, %v4404_v19 }
 0x9c9   : > { %v2579_v54 = vsel %vm1118_vm1, %v2578_v51, %v2506_v46  ;;  %v2706_v46 = vld [vmem:[#allocation11 + $0x18] sm:$0xff] }
 0x9ca   : > { %v2585_v56 = vperm.slane %v2579_v54, %v4404_v19  ;;  %v2615_v7 = vsel %vm1118_vm1, %v2614_v52, %v2589_v53  ;;  %v2616_v4 = vrot.slane %v2589_v53, 4  ;;  %2726 = vmatpush.msrb.mxu1 %v2706_v46  ;;  %v3506_v53 = vld [vmem:[%s5240_s15] ss:$0 sm:$0xff] }
 0x9cb   : > { %v2621_v11 = vperm.slane %v2615_v7, %v4410_v29 }
 0x9cc   : > { %v2603_v59 = vsel %vm1118_vm1, %v2602_v55, %v2585_v56  ;;  %v2604_v61 = vrot.slane %v2585_v56, 4  ;;  %v2617_v62 = vsel %vm1118_vm1, %v2601_v13, %v2616_v4  ;;  %v2704_v13 = vld [vmem:[#allocation11 + $0x8] sm:$0xff]  ;;  %2727 = vmatpush.msrb.mxu1 %v2705_v47 }
 0x9cd   : > { %v2609_v63 = vperm.slane %v2603_v59, %v4410_v29  ;;  %v2625_v57 = vperm.slane %v2617_v62, %v4410_v29  ;;  %v2630_v3 = vrot.slane %v2621_v11, 4 }
 0x9ce   : > { %v2605_v0 = vsel %vm1118_vm1, %v2597_v49, %v2604_v61  ;;  %2728 = vmatpush.msrb.mxu1 %v2704_v13 }
 0x9cf   : > { %v2613_v2 = vperm.slane %v2605_v0, %v4410_v29  ;;  %v2632_v8 = vrot.slane %v2625_v57, 4  ;;  %v2626_v6 = vrot.slane %v2609_v63, 4  ;;  %v2631_v23 = vsel %vm1118_vm1, 0.0, %v2630_v3  ;;  %v2769_v57 = vld [vmem:[#allocation13 + $0x10] sm:$0xff]  ;;  %v2768_v0 = vld [vmem:[#allocation13 + $0x8] sm:$0xff] }
 0x9d1   : > { %v2628_v15 = vrot.slane %v2613_v2, 4  ;;  %v2633_v9 = vsel %vm1118_vm1, 0.0, %v2632_v8  ;;  %v2645_v14 = vsel %vm1118_vm1, %v2632_v8, %v2621_v11  ;;  %v2627_v58 = vsel %vm1118_vm1, 0.0, %v2626_v6  ;;  %v2767_v2 = vld [vmem:[#allocation13] sm:$0xff] }
 0x9d2   : > { %v2649_v17 = vperm.slane %v2645_v14, %v4404_v19  ;;  %v2650_v18 = vrot.slane %v2633_v9, 4 }
 0x9d3   : > { %v2629_v22 = vsel %vm1118_vm1, 0.0, %v2628_v15  ;;  %v2634_v24 = vsel %vm1118_vm1, %v2628_v15, %v2609_v63  ;;  %v2770_v63 = vld [vmem:[#allocation13 + $0x18] sm:$0xff] }
 0x9d4   : > { %v2651_v25 = vsel %vm1118_vm1, %v2650_v18, %v2631_v23  ;;  %v2638_v26 = vperm.slane %v2634_v24, %v4404_v19  ;;  %v2639_v16 = vrot.slane %v2629_v22, 4  ;;  %v2670_v21 = vrot.slane %v2649_v17, 4  ;;  %2790 = vmatpush.msrb.mxu2 %v2770_v63  ;;  %v3507_v22 = vld [vmem:[%s5241_s16] ss:$0 sm:$0xff] }
 0x9d5   : > { %v2655_v30 = vperm.slane %v2651_v25, %v4404_v19  ;;  %v3508_v25 = vld [vmem:[%s5242_s17] ss:$0 sm:$0xff] }
 0x9d6   : > { %v2640_v31 = vsel %vm1118_vm1, %v2639_v16, %v2627_v58  ;;  %v2658_v32 = vrot.slane %v2638_v26, 4  ;;  %2791 = vmatpush.msrb.mxu2 %v2769_v57 }
 0x9d7   : > { %v2644_v12 = vperm.slane %v2640_v31, %v4404_v19  ;;  %v2671_v33 = vsel %vm1118_vm1, %v2655_v30, %v2670_v21  ;;  %v2668_v34 = vrot.slane %v2655_v30, 4  ;;  %v3509_v21 = vld [vmem:[%s5125_s19] ss:$0 sm:$0xff] }
 0x9d8   : > { %v2679_v35 = vperm.slane %v2671_v33, %v4410_v29  ;;  %2792 = vmatpush.msrb.mxu2 %v2768_v0 }
 0x9d9   : > { %v2659_v60 = vsel %vm1118_vm1, %v2644_v12, %v2658_v32  ;;  %v2656_v36 = vrot.slane %v2644_v12, 4  ;;  %v2669_v37 = vsel %vm1118_vm1, %v2668_v34, %v2649_v17 }
 0x9da   : > { %v2667_v38 = vperm.slane %v2659_v60, %v4410_v29  ;;  %v2684_v5 = vrot.slane %v2679_v35, 4  ;;  %v2675_v39 = vperm.slane %v2669_v37, %v4410_v29  ;;  %2793 = vmatpush.msrb.mxu2 %v2767_v2 }
 0x9db   : > { %v2657_v40 = vsel %vm1118_vm1, %v2656_v36, %v2638_v26 }
 0x9dc   : > { %v2685_v41 = vsel %vm1118_vm1, %v2684_v5, %v2667_v38  ;;  %v2663_v19 = vperm.slane %v2657_v40, %v4410_v29  ;;  %v2680_v27 = vrot.slane %v2675_v39, 4  ;;  %v2686_v20 = vrot.slane %v2667_v38, 4  ;;  %v2703_v29 = vld [vmem:[#allocation11] sm:$0xff] }
 0x9dd   : > { %2693 = vrot.lane.b32.xlu2 %v2685_v41, %s5238_s11  ;;  %2729 = vmatpush.msrb.mxu1 %v2703_v29  ;;  %s5243_s11 = sld [smem:[#allocation54_spill]] }
 0x9de   : > { %v2682_v42 = vrot.slane %v2663_v19, 4  ;;  %v2681_v43 = vsel %vm1118_vm1, %v2680_v27, %v2663_v19  ;;  %v2687_v45 = vsel %vm1118_vm1, %v2679_v35, %v2686_v20 }
 0x9e0   : > { %v2683_v44 = vsel %vm1118_vm1, %v2675_v39, %v2682_v42  ;;  %vm2854_vm1 = vcmask 523264  }
 0x9e1   : > { %2689 = vrot.lane.b32.xlu0 %v2683_v44, %s3983_s0 }
 0x9e3   : > { %v2849_v36 = vld [vmem:[%s5243_s11 + $0x38] sm:$0xff]  ;;  %v2848_v5 = vld [vmem:[%s5243_s11 + $0x30] sm:$0xff]  ;;  %v2847_v41 = vld [vmem:[%s5243_s11 + $0x28] sm:$0xff] }
 0x9e4   : > { %2866 = vmatpush.msra.mxu3 %v2849_v36  ;;  %v2846_v27 = vld [vmem:[%s5243_s11 + $0x20] sm:$0xff]  ;;  %v2845_v44 = vld [vmem:[%s5243_s11 + $0x18] sm:$0xff]  ;;  %v2844_v20 = vld [vmem:[%s5243_s11 + $0x10] sm:$0xff] }
 0x9e5   : > { %v2843_v46 = vld [vmem:[%s5243_s11 + $0x8] sm:$0xff]  ;;  %v2842_v29 = vld [vmem:[%s5243_s11] sm:$0xff] }
 0x9e6   : > { %2867 = vmatpush.msra.mxu3 %v2848_v5 }
 0x9e8   : > { %2868 = vmatpush.msra.mxu3 %v2847_v41 }
 0x9e9   : > { %2697 = vrot.lane.b32.xlu0 %v2687_v45, %s5239_s20  ;;  %s2957_s20 = scalar_lea.hbm %s5246_s1, %s4980_s4 }
 0x9ea   : > { %2869 = vmatpush.msra.mxu3 %v2846_v27  ;;  %s2961_s0 = sshll.u32 %s2957_s20, 4  ;;  %s2962_s0 = int_to_ptr.hbm [resolvable:$true] %s2961_s0 }
 0x9ec   : > { %2870 = vmatpush.msra.mxu3 %v2845_v44 }
 0x9ee   : > { %2871 = vmatpush.msra.mxu3 %v2844_v20 }
 0x9f0   : > { %2872 = vmatpush.msra.mxu3 %v2843_v46 }
 0x9f2   : > { %2873 = vmatpush.msra.mxu3 %v2842_v29 }
 0xa37   : > { %v2694_v50 = vpop.permute.xlu2 %2693 }
 0xa53   : > { %v2690_v48 = vpop.permute.xlu0 %2689 }
 0xa54   : > { %v2700_v49 = vsel %vm1472_vm2, %v2681_v43, %v2690_v48 }
 0xa55   : > { %v2701_v28 = vsel %vm1836_vm3, %v2700_v49, %v2694_v50 }
 0xa5b   : > { %v2698_v51 = vpop.permute.xlu0 %2697 }
 0xa5c   : > { %v2702_v52 = vsel %vm1838_vm4, %v2701_v28, %v2698_v51 }
 0xa5d   : > { %3349 = vmatmul.msk.f32.vlgmr.msrb.gmra.mxu1 %vm1073_vm0, %v2702_v52 }
 0xada   : > { %v2731_v54 = vpop.f32.mrf.mxu1 }
 0xadb   : > { %v2732_v55 = vadd.f32 %v3506_v53, %v2731_v54 }
 0xadd   : > { %v2734_v56 = vadd.f32 %v2732_v55, %v4720_v1 }
 0xadf   : > { %v2737_v7 = vsel %vm1073_vm0, %v2734_v56, 0.0 }
 0xae0   : > { %2738 = vadd.xlane.f32.xlu0 %v2737_v7 }
 0xb53   : > { %v2739_v4 = vpop.xlane.xlu0 %2738 }
 0xb54   : > { %v2740_v11 = vmul.f32 %v2739_v4, %v4650_v10 }
 0xb56   : > { %v2741_v59 = vsub.f32 %v2734_v56, %v2740_v11 }
 0xb58   : > { %v2742_v61 = vmul.f32 %v2741_v59, %v2741_v59 }
 0xb5a   : > { %v2743_v62 = vsel %vm1073_vm0, %v2742_v61, 0.0 }
 0xb5b   : > { %2744 = vadd.xlane.f32.xlu1 %v2743_v62 }
 0xbce   : > { %v2745_v3 = vpop.xlane.xlu1 %2744 }
 0xbcf   : > { %v2746_v1 = vmul.f32 %v2745_v3, %v4650_v10 }
 0xbd1   : > { %v2747_v8 = vadd.f32 1e-05, %v2746_v1 }
 0xbd3   : > { %3549 = vrsqrt.f32 %v2747_v8  ;;  %vm2754_vm10 = vweird.f32 %v2747_v8 }
 0xbd9   : > { %v3550_v6 = vpop.eup %3549 }
 0xbda   : > { %v2749_v15 = vmul.f32 %v3550_v6, %v2747_v8  ;;  %vm2755_vm9 = vweird.f32 %v3550_v6  ;;  %v3510_v8 = vld [vmem:[%s5244_s9] ss:$0 sm:$0xff]  ;;  %s3779_s9 = sshra.s32 %s2962_s0, 4  ;;  %s3780_s9 = int_to_ptr.hbm [resolvable:$true] %s3779_s9 }
 0xbdb   : > { %vm2756_vm11 = vmor %vm2754_vm10, %vm2755_vm9  ;;  %s3781_s26 = scalar_lea.hbm %s3780_s9, 8  ;;  %p3786_p1 = scmp.lt.s32.totalorder %s3780_s9, %s5246_s1 }
 0xbdc   : > { %v2750_v9 = vmul.f32 %v3550_v6, %v2749_v15  ;;  %p3782_p4 = scmp.ne.s32.totalorder %s3780_s9, %s3781_s26  ;;  %p3787_p11 = scmp.lt.s32.totalorder %s3785_s2, %s3781_s26 }
 0xbde   : > { %v2751_v14 = vmul.f32 0.5, %v2750_v9  ;;  %p3783_p5 = pnand %p3782_p4, %p4212_p3  ;;  %p3788_p2 = por %p3787_p11, %p3786_p1 }
 0xbe0   : > { %v2752_v17 = vsub.f32 1.5, %v2751_v14  ;;  %p3784_p7 = pneg %p3783_p5 }
 0xbe2   : > { %v2753_v18 = vmul.f32 %v3550_v6, %v2752_v17  ;;  %p3789_p10 = pnand %p3788_p2, %p3784_p7 }
 0xbe4   : > { %v2757_v23 = vsel %vm2756_vm11, %v3550_v6, %v2753_v18 }
 0xbe5   : > { %v2758_v24 = vmul.f32 %v2757_v23, %v2741_v59 }
 0xbe7   : > { %v2762_v26 = vmul.f32 %v3507_v22, %v2758_v24 }
 0xbe9   : > { %v4937_v16 = vadd.f32 %v3508_v25, %v2762_v26 }
 0xbeb   : > { %3350 = vmatmul.msk.f32.vlgmr.msrb.gmra.mxu2 %vm1073_vm0, %v4937_v16 }
 0xc6e   : > { %v2795_v58 = vpop.f32.mrf.mxu2 }
 0xc6f   : > { %v2796_v30 = vadd.f32 %v3509_v21, %v2795_v58 }
 0xc71   : > { %v2799_v31 = vmul.f32 0.70710677, %v2796_v30  ;;  %v2798_v2 = vmul.f32 0.5, %v2796_v30 }
 0xc73   : > { %v2800_v32 = vmul.f32 %v2799_v31, %v2799_v31 }
 0xc75   : > { %v2801_v12 = vmin.f32 %v2800_v32, 16.0 }
 0xc77   : > { %v2802_v33 = vmul.f32 2.1237322e-06, %v2801_v12  ;;  %v2813_v34 = vmul.f32 3.8918573e-05, %v2801_v12 }
 0xc79   : > { %v2803_v35 = vadd.f32 0.00028619796, %v2802_v33  ;;  %v2814_v60 = vadd.f32 0.001143296, %v2813_v34 }
 0xc7b   : > { %v2804_v37 = vmul.f32 %v2803_v35, %v2801_v12  ;;  %v2815_v38 = vmul.f32 %v2814_v60, %v2801_v12 }
 0xc7d   : > { %v2816_v39 = vadd.f32 0.014752088, %v2815_v38  ;;  %v2805_v40 = vadd.f32 0.0036580483, %v2804_v37 }
 0xc7f   : > { %v2817_v19 = vmul.f32 %v2816_v39, %v2801_v12  ;;  %v2806_v43 = vmul.f32 %v2805_v40, %v2801_v12 }
 0xc81   : > { %v2818_v42 = vadd.f32 0.112945676, %v2817_v19  ;;  %v2807_v13 = vadd.f32 0.05243302, %v2806_v43 }
 0xc83   : > { %v2819_v45 = vmul.f32 %v2818_v42, %v2801_v12  ;;  %v2808_v50 = vmul.f32 %v2807_v13, %v2801_v12 }
 0xc85   : > { %v2820_v47 = vadd.f32 0.4994258, %v2819_v45  ;;  %v2809_v51 = vadd.f32 0.18741608, %v2808_v50 }
 0xc87   : > { %v2821_v48 = vmul.f32 %v2820_v47, %v2801_v12  ;;  %v2810_v52 = vmul.f32 %v2809_v51, %v2801_v12 }
 0xc89   : > { %v2822_v49 = vadd.f32 1.0, %v2821_v48  ;;  %v2811_v56 = vadd.f32 1.1283791, %v2810_v52 }
 0xc8b   : > { %3551 = vrcp.f32 %v2822_v49  ;;  %v2834_v55 = vand.u32 2147483648, %v2822_v49  ;;  %v2832_v4 = vand.u32 2147483647, %v2822_v49  ;;  %vm2828_vm13 = vweird.f32 %v2822_v49 }
 0xc8c   : > { %v2812_v61 = vmul.f32 %v2811_v56, %v2799_v31 }
 0xc8d   : > { %v2835_v59 = vor.u32 1.1754944e-38, %v2834_v55  ;;  %vm2833_vm15 = vcmp.eq.f32.partialorder %v2832_v4, 8.507059e+37 }
 0xc91   : > { %v3552_v28 = vpop.eup %3551 }
 0xc92   : > { %v2824_v53 = vmul.f32 %v3552_v28, %v2822_v49  ;;  %vm2829_vm12 = vweird.f32 %v3552_v28 }
 0xc93   : > { %vm2830_vm14 = vmor %vm2828_vm13, %vm2829_vm12 }
 0xc94   : > { %v2825_v54 = vsub.f32 1.0, %v2824_v53 }
 0xc96   : > { %v2826_v7 = vmul.f32 %v3552_v28, %v2825_v54 }
 0xc98   : > { %v2827_v11 = vadd.f32 %v3552_v28, %v2826_v7 }
 0xc9a   : > { %v2831_v62 = vsel %vm2830_vm14, %v3552_v28, %v2827_v11 }
 0xc9b   : > { %v2836_v63 = vsel %vm2833_vm15, %v2835_v59, %v2831_v62 }
 0xc9c   : > { %v2837_v57 = vmul.f32 %v2836_v63, %v2812_v61 }
 0xc9e   : > { %v3351_v0 = vclamps-f32 %v2837_v57, 1.0 }
 0xca0   : > { %v2840_v3 = vadd.f32 1.0, %v3351_v0 }
 0xca2   : > { %v2841_v1 = vmul.f32 %v2840_v3, %v2798_v2 }
 0xca4   : > { %3352 = vmatmul.msk.f32.vlgmr.msra.gmra.mxu3 %vm2854_vm1, %v2841_v1 }
 0xd27   : > { %v2875_v6 = vpop.f32.mrf.mxu3 }
 0xd28   : > { %v2876_v15 = vadd.f32 %v3510_v8, %v2875_v6 }
 0xd2a   : > { %v2878_v9 = vadd.f32 %v2876_v15, %v4937_v16 }
 0xd2c   : > { %v2881_v14 = vsel %vm1073_vm0, %v2878_v9, 0.0 }
 0xd2d   : > { %2882 = vadd.xlane.f32.xlu2 %v2881_v14 }
 0xda0   : > { %v2883_v17 = vpop.xlane.xlu2 %2882 }
 0xda1   : > { %v2884_v18 = vmul.f32 %v2883_v17, %v4650_v10 }
 0xda3   : > { %v4974_v22 = vsub.f32 %v2878_v9, %v2884_v18 }
 0xda5   : > { %v2886_v23 = vmul.f32 %v4974_v22, %v4974_v22 }
 0xda7   : > { %v2887_v24 = vsel %vm1073_vm0, %v2886_v23, 0.0 }
 0xda8   : > { %2888 = vadd.xlane.f32.xlu1 %v2887_v24 }
 0xda9   : > { %3792 = shalt.err (!%p3789_p10)
}
 0xdaa   : > { %3386 = dma.vmem_to_hbm [thread:$0]  (%p4212_p3), %s2960_s25, 128, %s2962_s0, %s5171_s24  }
 0xdab   : > { %s5248_s20 = sld [smem:[#allocation61_spill]]  ;;  %s5249_s3 = scalar_lea.vmem [#allocation18], %s4323_s7 }
 0xdac   : > { %s2987_s11 = sshll.u32 %s5249_s3, 4  ;;  %s2928_s26 = scalar_lea.sflag [#allocation19], %s4332_s12  ;;  %s2988_s11 = int_to_ptr.vmem [resolvable:$true] %s2987_s11 }
 0xdb1   : > { %s2985_s18 = scalar_lea.hbm %s5248_s20, %s4980_s4  ;;  %s3813_s25 = scalar_lea.hbm %s5248_s20, 16 }
 0xdb2   : > { %s2989_s2 = sshll.u32 %s2985_s18, 4  ;;  %s2990_s2 = int_to_ptr.hbm [resolvable:$true] %s2989_s2 }
 0xdb3   : > { %s3807_s9 = sshra.s32 %s2990_s2, 4  ;;  %s3808_s9 = int_to_ptr.hbm [resolvable:$true] %s3807_s9 }
 0xdb4   : > { %s3809_s8 = scalar_lea.hbm %s3808_s9, 8  ;;  %p3814_p12 = scmp.lt.s32.totalorder %s3808_s9, %s5248_s20 }
 0xdb5   : > { %p3810_p13 = scmp.ne.s32.totalorder %s3808_s9, %s3809_s8  ;;  %p3815_p0 = scmp.lt.s32.totalorder %s3813_s25, %s3809_s8 }
 0xdb7   : > { %p3811_p8 = pnand %p3810_p13, %p4212_p3  ;;  %p3816_p4 = por %p3815_p0, %p3814_p12 }
 0xdb9   : > { %p3812_p9 = pneg %p3811_p8 }
 0xdbb   : > { %p3817_p5 = pnand %p3816_p4, %p3812_p9 }
 0xdbd   : > { %3820 = shalt.err (!%p3817_p5)
}
 0xdbe   : > { %3388 = dma.vmem_to_hbm [thread:$0]  (%p4212_p3), %s2988_s11, 128, %s2990_s2, %s2928_s26  }
 0xdbf   : > { %s5250_s13 = scalar_lea.vmem [#allocation17], %s4323_s7  ;;  %s5251_s6 = scalar_lea.vmem [#allocation20], %s4323_s7 }
 0xdc0   : > { %s2973_s1 = sshll.u32 %s5250_s13, 4  ;;  %s5024_s18 = sshll.u32 %s5251_s6, 4  ;;  %s2974_s1 = int_to_ptr.vmem [resolvable:$true] %s2973_s1  ;;  %s3002_s18 = int_to_ptr.vmem [resolvable:$true] %s5024_s18 }
 0xdc1   : > { %s5252_s8 = sld [smem:[#allocation60_spill]] }
 0xdc2   : > { %s5254_s15 = sld [smem:[#allocation62_spill]] }
 0xdc7   : > { %s5253_s25 = smov %s5252_s8  ;;  %s2971_s0 = scalar_lea.hbm %s5252_s8, %s4980_s4 }
 0xdc8   : > { %s2975_s23 = sshll.u32 %s2971_s0, 4  ;;  %s2999_s16 = scalar_lea.hbm %s5254_s15, %s4980_s4  ;;  %s2976_s23 = int_to_ptr.hbm [resolvable:$true] %s2975_s23 }
 0xdc9   : > { %s3835_s17 = sshra.s32 %s2976_s23, 4  ;;  %s3841_s6 = scalar_lea.hbm %s5253_s25, 16  ;;  %s3836_s17 = int_to_ptr.hbm [resolvable:$true] %s3835_s17 }
 0xdca   : > { %s3837_s11 = scalar_lea.hbm %s3836_s17, 8  ;;  %p3842_p2 = scmp.lt.s32.totalorder %s3836_s17, %s5253_s25 }
 0xdcb   : > { %p3838_p7 = scmp.ne.s32.totalorder %s3836_s17, %s3837_s11  ;;  %p3843_p10 = scmp.lt.s32.totalorder %s3841_s6, %s3837_s11 }
 0xdcd   : > { %p3839_p1 = pnand %p3838_p7, %p4212_p3  ;;  %p3844_p13 = por %p3843_p10, %p3842_p2 }
 0xdcf   : > { %p3840_p11 = pneg %p3839_p1 }
 0xdd1   : > { %p3845_p8 = pnand %p3844_p13, %p3840_p11 }
 0xdd3   : > { %3848 = shalt.err (!%p3845_p8)
}
 0xdd4   : > { %s5255_s14 = scalar_lea.sflag [#allocation16], %s4332_s12  ;;  %s3003_s24 = sshll.u32 %s2999_s16, 4  ;;  %s3004_s24 = int_to_ptr.hbm [resolvable:$true] %s3003_s24 }
 0xdd5   : > { %3387 = dma.vmem_to_hbm [thread:$0]  (%p4212_p3), %s2974_s1, 128, %s2976_s23, %s5255_s14  }
 0xdd6   : > { %s3863_s8 = sshra.s32 %s3004_s24, 4  ;;  %s3869_s2 = scalar_lea.hbm %s5254_s15, 16  ;;  %s3864_s8 = int_to_ptr.hbm [resolvable:$true] %s3863_s8 }
 0xdd7   : > { %s3865_s0 = scalar_lea.hbm %s3864_s8, 8  ;;  %p3870_p4 = scmp.lt.s32.totalorder %s3864_s8, %s5254_s15 }
 0xdd8   : > { %p3866_p9 = scmp.ne.s32.totalorder %s3864_s8, %s3865_s0  ;;  %p3871_p5 = scmp.lt.s32.totalorder %s3869_s2, %s3865_s0 }
 0xdda   : > { %p3867_p12 = pnand %p3866_p9, %p4212_p3  ;;  %p3872_p7 = por %p3871_p5, %p3870_p4 }
 0xddc   : > { %p3868_p0 = pneg %p3867_p12 }
 0xdde   : > { %p3873_p1 = pnand %p3872_p7, %p3868_p0 }
 0xde0   : > { %3876 = shalt.err (!%p3873_p1)
}
 0xde1   : > { %3389 = dma.vmem_to_hbm [thread:$0]  (%p4212_p3), %s3002_s18, 128, %s3004_s24, %s2928_s26  }
 0xde2   : > { %s5256_s1 = sld [smem:[#allocation56_spill]]  ;;  %s1032_s8 = scalar_lea.vmem [#allocation14], %s4323_s7 }
 0xde3   : > { %s5257_s23 = sld [smem:[#allocation58_spill]]  ;;  %s2945_s0 = sshll.u32 %s1032_s8, 4  ;;  %s2946_s0 = int_to_ptr.vmem [resolvable:$true] %s2945_s0 }
 0xde4   : > { %s5258_s24 = sld [smem:[#allocation57_spill]]  ;;  %s2913_s11 = scalar_lea.sflag [#allocation4], %s4320_s28 }
 0xde8   : > { %v3511_v33 = vld [vmem:[%s5256_s1] ss:$0 sm:$0xff] }
 0xde9   : > { %s2943_s3 = scalar_lea.hbm %s5257_s23, %s4980_s4  ;;  %s3897_s7 = scalar_lea.hbm %s5257_s23, 16 }
 0xdea   : > { %v3512_v35 = vld [vmem:[%s5258_s24] ss:$0 sm:$0xff]  ;;  %s2947_s17 = sshll.u32 %s2943_s3, 4  ;;  %s2948_s17 = int_to_ptr.hbm [resolvable:$true] %s2947_s17 }
 0xdeb   : > { %s3891_s2 = sshra.s32 %s2948_s17, 4  ;;  %s3892_s2 = int_to_ptr.hbm [resolvable:$true] %s3891_s2 }
 0xdec   : > { %s3893_s4 = scalar_lea.hbm %s3892_s2, 8  ;;  %p3898_p13 = scmp.lt.s32.totalorder %s3892_s2, %s5257_s23 }
 0xded   : > { %p3894_p11 = scmp.ne.s32.totalorder %s3892_s2, %s3893_s4  ;;  %p3899_p8 = scmp.lt.s32.totalorder %s3897_s7, %s3893_s4 }
 0xdef   : > { %p3895_p2 = pnand %p3894_p11, %p4212_p3  ;;  %p3900_p9 = por %p3899_p8, %p3898_p13 }
 0xdf1   : > { %p3896_p10 = pneg %p3895_p2 }
 0xdf3   : > { %p3901_p12 = pnand %p3900_p9, %p3896_p10 }
 0xe1b   : > { %v2889_v25 = vpop.xlane.xlu1 %2888 }
 0xe1c   : > { %v2890_v26 = vmul.f32 %v2889_v25, %v4650_v10 }
 0xe1e   : > { %v2891_v16 = vadd.f32 1e-05, %v2890_v26 }
 0xe20   : > { %3553 = vrsqrt.f32 %v2891_v16  ;;  %vm2898_vm3 = vweird.f32 %v2891_v16 }
 0xe26   : > { %v3554_v21 = vpop.eup %3553 }
 0xe27   : > { %v2893_v58 = vmul.f32 %v3554_v21, %v2891_v16  ;;  %vm2899_vm2 = vweird.f32 %v3554_v21 }
 0xe28   : > { %vm2900_vm4 = vmor %vm2898_vm3, %vm2899_vm2 }
 0xe29   : > { %v2894_v30 = vmul.f32 %v3554_v21, %v2893_v58 }
 0xe2b   : > { %v2895_v31 = vmul.f32 0.5, %v2894_v30 }
 0xe2d   : > { %v2896_v32 = vsub.f32 1.5, %v2895_v31 }
 0xe2f   : > { %v2897_v12 = vmul.f32 %v3554_v21, %v2896_v32 }
 0xe31   : > { %v2901_v10 = vsel %vm2900_vm4, %v3554_v21, %v2897_v12 }
 0xe32   : > { %v2902_v34 = vmul.f32 %v2901_v10, %v4974_v22 }
 0xe34   : > { %v2906_v60 = vmul.f32 %v3511_v33, %v2902_v34 }
 0xe36   : > { %v2910_v36 = vadd.f32 %v3512_v35, %v2906_v60 }
 0xe38   : > { %2911 = vst.msk [vmem:[%s1032_s8] sm:$0xff] %vm1073_vm0, %v2910_v36 }
 0xe39   : > { %3904 = shalt.err (!%p3901_p12)
}
 0xe3a   : > { %3385 = dma.vmem_to_hbm [thread:$0]  (%p4212_p3), %s2946_s0, 128, %s2948_s17, %s2913_s11  }
 0xe3b PF: > { %s5259_s28 = sld [smem:[#allocation29_spill]]  ;;  %p5261_p0 = scmp.ge.s32.totalorder %s3967_s30, 2 }
 0xe3d   : > { %p3419_p4 = pnand %p5261_p0, %p4167_p6 }
 0xe3f   : > { %p3420_p5 = pneg %p3419_p4 }
 0xe41   : > { %s3015_s26 = sand.u32 1, %s5259_s28  }
 0xe42   : > { %s3016_s18 = scalar_lea.sflag [#allocation4], %s3015_s26 }
 0xe43   : > { %3942 = dma.done.wait (%p3420_p5), %s3016_s18, 128  }
 0xe44   : > { %3944 = vsyncadd (%p3420_p5), %s3016_s18, 4294967168  ;;  %s5262_s3 = sadd.s32 4294967294, %s3967_s30  }
 0xe45   : > { %s3025_s9 = sand.u32 1, %s5262_s3  }
 0xe46   : > { %s3026_s14 = scalar_lea.sflag [#allocation16], %s3025_s9 }
 0xe47   : > { %3946 = dma.done.wait (%p3420_p5), %s3026_s14, 256  }
 0xe48   : > { %3948 = vsyncadd (%p3420_p5), %s3026_s14, 4294967040  ;;  %s3046_s10 = scalar_lea.sflag [#allocation19], %s3025_s9 }
 0xe49   : > { %3950 = dma.done.wait (%p3420_p5), %s3046_s10, 256  }
 0xe4a   : > { %3952 = vsyncadd (%p3420_p5), %s3046_s10, 4294967040  ;;  %s5263_s30 = sld [smem:[#allocation32_spill]]  ;;  %s5266_s8 = smov %s3959_s5 }
 0xe4b   : > { %s5264_s24 = sld [smem:[#allocation30_spill]] }
 0xe4c   : > { %s5265_s9 = sld [smem:[#allocation34_spill]] }
 0xe50   : > { %p55_p3 = scmp.ge.s32.totalorder %s5263_s30, 4  }
 0xe51   : > { %s5267_s5 = smov %s5264_s24 }
 0xe52   :  { %57 = sbr.rel (!%p55_p3) target bundleno = 43 (0x2b), region = 274 }
 0xe57   :  { %3062 = vsyncpa [#allocation3], 1 }
 0xe58   :  { %3064 = vsyncpa [#allocation3 + $0x1], 1 }
 0xe59   :  { %3065 = vsyncpa [#allocation6], 1 }
 0xe5a   :  { %3067 = vsyncpa [#allocation6 + $0x1], 1 }
 0xe5b   :  { %3068 = vsyncpa [#allocation9], 1 }
 0xe5c   :  { %3070 = vsyncpa [#allocation9 + $0x1], 1 }
 0xe5d   :  { %3071 = vsyncpa [#allocation12], 1 }
 0xe5e   :  { %3072 = vsyncpa [#allocation4], 1 }
 0xe5f   :  { %3074 = vsyncpa [#allocation4 + $0x1], 1 }
 0xe60   :  { %3075 = vsyncpa [#allocation16], 1 }
 0xe61   :  { %3077 = vsyncpa [#allocation16 + $0x1], 1 }
 0xe62   :  { %3078 = vsyncpa [#allocation19], 1 }
 0xe63   :  { %3080 = vsyncpa [#allocation19 + $0x1], 1 }

</bundles_post_ra>
